<compile_context>
chip_gen: v7x
topology: tpu7x:2x2x1
jax: 0.10.0
libtpu: 0.0.40
codegen_flags: <defaults>
</compile_context>

<pallas_src>
import functools
import numpy as np
import jax
import jax.numpy as jnp
from jax import lax
from jax.experimental import pallas as pl

_NEG = -1e9  # kills padded / masked-out logit lanes in the softmax


def _round_up(n, m):
    return ((n + m - 1) // m) * m


def _to_time_major_padded(x_btd, b_pad):
    """(B, T, D) -> (T*b_pad, D) time-major, zero-padded batch rows."""
    B, T, D = x_btd.shape
    x_tbd = jnp.transpose(x_btd, (1, 0, 2))
    if b_pad > B:
        x_tbd = jnp.pad(x_tbd, ((0, 0), (0, b_pad - B), (0, 0)))
    return x_tbd.reshape(T * b_pad, D)


def _pad_rows(a, b_pad):
    return a if a.shape[0] == b_pad else jnp.pad(a, ((0, b_pad - a.shape[0]), (0, 0)))


# ----------------------------------------------------------------------------
# Pallas LSTM kernel: full sequence, one invocation (no grid).
#   x_ref : (T*Bp, IN) bf16 time-major flattened input (row = t*Bp + b)
#   Also serves the FUSED two-LSTM case: with gate-interleaved block-diagonal
#   weights, the fused pair is just "one LSTM with hidden = 2H".
# ----------------------------------------------------------------------------
def _lstm_kernel(x_ref, h0_ref, c0_ref, w_ih_ref, w_hh_ref, b_ref,
                 w_out_ref, b_out_ref, mask_ref, *out_refs,
                 seq_len, batch, hidden, compute_probs):
    T, Bp, H = seq_len, batch, hidden
    if compute_probs:
        logits_ref, probs_ref, h_fin_ref, c_fin_ref = out_refs
    else:
        logits_ref, h_fin_ref, c_fin_ref = out_refs

    # (1) Hoisted input projection: one bf16 MXU matmul over all T*Bp rows,
    #     f32 accumulation — off the serial critical path.
    gx = jnp.dot(x_ref[...], w_ih_ref[...],
                 preferred_element_type=jnp.float32) + b_ref[...]      # (T*Bp, 4H)

    w_hh = w_hh_ref[...]                                               # bf16
    h = h0_ref[...]                                                    # (Bp, H) f32
    c = c0_ref[...]                                                    # (Bp, H) f32

    # (2) Serial recurrence: only h @ W_hh + gate nonlinearities per step.
    #     T is small and static -> fully unrolled; h history stays in regs.
    h_list = []
    for t in range(T):
        g = gx[t * Bp:(t + 1) * Bp, :] + jnp.dot(
            h.astype(jnp.bfloat16), w_hh,
            preferred_element_type=jnp.float32)                        # (Bp, 4H)
        sg = jax.nn.sigmoid(g)      # one EUP pass over the full gate block
        tg = jnp.tanh(g)            # one EUP pass over the full gate block
        c = sg[:, H:2 * H] * c + sg[:, :H] * tg[:, 2 * H:3 * H]
        h = sg[:, 3 * H:] * jnp.tanh(c)
        h_list.append(h)
    h_hist = jnp.concatenate(h_list, axis=0)                           # (T*Bp, H)

    # (3) Output head (+ optional softmax) once, batched over all rows.
    logits = jnp.dot(h_hist.astype(jnp.bfloat16), w_out_ref[...],
                     preferred_element_type=jnp.float32) + b_out_ref[...]
    logits_ref[...] = logits                                           # lane-dense slab
    if compute_probs:
        z = logits + mask_ref[...]          # -1e9 on non-softmax lanes
        m = jnp.max(z, axis=-1, keepdims=True)
        e = jnp.exp(z - m)
        probs_ref[...] = e * pl.reciprocal(
            jnp.sum(e, axis=-1, keepdims=True), approx=False)
    h_fin_ref[...] = h
    c_fin_ref[...] = c


def _run_lstm_kernel(x_flat, h0, c0, w_ih, w_hh, b, w_out, b_out, mask,
                     *, compute_probs):
    TBp = x_flat.shape[0]
    Bp, H = h0.shape
    T = TBp // Bp
    OUTP = w_out.shape[-1]
    out_shape = [jax.ShapeDtypeStruct((TBp, OUTP), jnp.float32)]
    if compute_probs:
        out_shape.append(jax.ShapeDtypeStruct((TBp, OUTP), jnp.float32))
    out_shape += [jax.ShapeDtypeStruct((Bp, H), jnp.float32),
                  jax.ShapeDtypeStruct((Bp, H), jnp.float32)]
    kernel = functools.partial(_lstm_kernel, seq_len=T, batch=Bp, hidden=H,
                               compute_probs=compute_probs)
    return pl.pallas_call(kernel, out_shape=tuple(out_shape))(
        x_flat, h0, c0, w_ih, w_hh, b, w_out, b_out, mask)


# ----------------------------------------------------------------------------
# Single-LSTM wrapper (used for the labels=None path).
# ----------------------------------------------------------------------------
def lstm_forward_pallas(x_btd, h0, c0, params, *, compute_probs=True):
    B, T, _ = x_btd.shape
    H = h0.shape[-1]
    OUT = params["w_out"].shape[-1]
    OUTP = _round_up(OUT, 128)
    Bp = _round_up(B, 8)

    x_flat = _to_time_major_padded(x_btd, Bp).astype(jnp.bfloat16)
    h0p, c0p = _pad_rows(h0, Bp), _pad_rows(c0, Bp)
    w_ih = params["w_ih"].astype(jnp.bfloat16)
    w_hh = params["w_hh"].astype(jnp.bfloat16)
    b = params["b"].astype(jnp.float32)
    w_out = jnp.pad(params["w_out"], ((0, 0), (0, OUTP - OUT))).astype(jnp.bfloat16)
    b_out = jnp.pad(params["b_out"].astype(jnp.float32),
                    ((0, 0), (0, OUTP - OUT)), constant_values=_NEG)
    mask = jnp.zeros((1, OUTP), jnp.float32)   # pad lanes already killed by b_out

    outs = _run_lstm_kernel(x_flat, h0p, c0p, w_ih, w_hh, b, w_out, b_out,
                            mask, compute_probs=compute_probs)
    if compute_probs:
        logits_f, probs_f, h_f, c_f = outs
    else:
        logits_f, h_f, c_f = outs
        probs_f = None
    logits = jnp.transpose(logits_f.reshape(T, Bp, OUTP)[:, :B, :OUT], (1, 0, 2))
    probs = (None if probs_f is None else
             jnp.transpose(probs_f.reshape(T, Bp, OUTP)[:, :B, :OUT], (1, 0, 2)))
    return logits, probs, (h_f[:B], c_f[:B])


# ----------------------------------------------------------------------------
# Fused two-LSTM wrapper (explicit-labels path): sup + policy in ONE kernel.
# Gate-interleaved block-diagonal weights -> one 8H-wide recurrent matmul/step.
# ----------------------------------------------------------------------------
def fused_forward_pallas(x_sup, x_pol, sup_latent, pol_latent,
                         sup_params, pol_params):
    B, T, _ = x_sup.shape
    H = sup_latent[0].shape[-1]
    OUT_S = sup_params["w_out"].shape[-1]
    OUT_P = pol_params["w_out"].shape[-1]
    OUTP = _round_up(OUT_S + OUT_P, 128)
    Bp = _round_up(B, 8)

    def fuse_gate_cols(ws, wp):
        # (R, 4H) sup cols + (R, 4H) pol cols -> (R, 8H) with per-gate
        # interleave [i_s,i_p | f_s,f_p | g_s,g_p | o_s,o_p].
        R = ws.shape[0]
        return jnp.concatenate(
            [ws.reshape(R, 4, H), wp.reshape(R, 4, H)], axis=-1).reshape(R, 8 * H)

    zs = lambda r: jnp.zeros((r, 4 * H), jnp.float32)
    IN_S = sup_params["w_ih"].shape[0]
    IN_P = pol_params["w_ih"].shape[0]
    w_ih = jnp.concatenate(
        [fuse_gate_cols(sup_params["w_ih"], zs(IN_S)),
         fuse_gate_cols(zs(IN_P), pol_params["w_ih"])], axis=0).astype(jnp.bfloat16)
    w_hh = jnp.concatenate(
        [fuse_gate_cols(sup_params["w_hh"], zs(H)),
         fuse_gate_cols(zs(H), pol_params["w_hh"])], axis=0).astype(jnp.bfloat16)
    b = fuse_gate_cols(sup_params["b"], pol_params["b"]).astype(jnp.float32)

    w_out = jnp.zeros((2 * H, OUTP), jnp.float32)
    w_out = w_out.at[:H, :OUT_S].set(sup_params["w_out"])
    w_out = w_out.at[H:, OUT_S:OUT_S + OUT_P].set(pol_params["w_out"])
    w_out = w_out.astype(jnp.bfloat16)
    b_out = jnp.full((1, OUTP), _NEG, jnp.float32)
    b_out = b_out.at[:, :OUT_S].set(sup_params["b_out"])
    b_out = b_out.at[:, OUT_S:OUT_S + OUT_P].set(pol_params["b_out"])
    mask = jnp.full((1, OUTP), _NEG, jnp.float32)       # softmax only over pol lanes
    mask = mask.at[:, OUT_S:OUT_S + OUT_P].set(0.0)

    x_flat = _to_time_major_padded(
        jnp.concatenate([x_sup, x_pol], axis=-1), Bp).astype(jnp.bfloat16)
    h0 = _pad_rows(jnp.concatenate([sup_latent[0], pol_latent[0]], -1), Bp)
    c0 = _pad_rows(jnp.concatenate([sup_latent[1], pol_latent[1]], -1), Bp)

    logits_f, probs_f, h_f, c_f = _run_lstm_kernel(
        x_flat, h0, c0, w_ih, w_hh, b, w_out, b_out, mask, compute_probs=True)

    logits_tb = logits_f.reshape(T, Bp, OUTP)[:, :B]
    probs_tb = probs_f.reshape(T, Bp, OUTP)[:, :B]
    sup_logits = jnp.transpose(logits_tb[..., :OUT_S], (1, 0, 2))
    pol_logits = jnp.transpose(logits_tb[..., OUT_S:OUT_S + OUT_P], (1, 0, 2))
    pis = jnp.transpose(probs_tb[..., OUT_S:OUT_S + OUT_P], (1, 0, 2))
    sup_latent_new = (h_f[:B, :H], c_f[:B, :H])
    latent_new = (h_f[:B, H:], c_f[:B, H:])
    return sup_logits, pol_logits, pis, sup_latent_new, latent_new


# ----------------------------------------------------------------------------
# Pure-JAX LSTM reference (for self-check only).
# ----------------------------------------------------------------------------
def lstm_forward_ref(x_btd, h0, c0, p):
    H = h0.shape[-1]

    def step(carry, x_t):
        h, c = carry
        gates = x_t @ p["w_ih"] + h @ p["w_hh"] + p["b"]
        i = jax.nn.sigmoid(gates[:, :H])
        f = jax.nn.sigmoid(gates[:, H:2 * H])
        g = jnp.tanh(gates[:, 2 * H:3 * H])
        o = jax.nn.sigmoid(gates[:, 3 * H:])
        c = f * c + i * g
        h = o * jnp.tanh(c)
        logits = h @ p["w_out"] + p["b_out"]
        return (h, c), logits

    (hf, cf), logits_t = lax.scan(step, (h0, c0), jnp.transpose(x_btd, (1, 0, 2)))
    logits = jnp.transpose(logits_t, (1, 0, 2))
    return logits, jax.nn.softmax(logits, -1), (hf, cf)


# ----------------------------------------------------------------------------
# SupSepSoftmaxLSTMPolicy.forward  (JAX glue around the Pallas LSTM kernel(s))
# ----------------------------------------------------------------------------
def sup_sep_forward(obs_flat, prev_actions, labels, policy_params, sup_params,
                    latent=None, sup_latent=None, *,
                    label_num, label_dim, action_dim, hidden, impl="pallas"):
    B, T, _ = obs_flat.shape
    zeros_lat = (jnp.zeros((B, hidden), jnp.float32),
                 jnp.zeros((B, hidden), jnp.float32))
    if latent is None:
        latent = zeros_lat          # policy.latent_0
    if sup_latent is None:
        sup_latent = zeros_lat      # sup_learner.latent_0

    a_oh = jax.nn.one_hot(prev_actions[..., 0], action_dim, dtype=jnp.float32)
    x_sup = jnp.concatenate([obs_flat, a_oh], axis=-1)

    # --- to_policy_inputs glue -------------------------------------------------
    obs4 = obs_flat.reshape(B, T, label_num + 1, -1)
    valid_mask = jnp.sum(jnp.abs(obs4), axis=-1) != 0        # (B, T, label_num+1)
    valid_mask = valid_mask[..., 1:label_num + 1]            # (B, T, label_num)

    def build_pol_x(lab):
        lab = jnp.where(valid_mask, lab, 0)
        oh = jax.nn.one_hot(lab, label_dim, dtype=jnp.float32)
        oh = jnp.where(valid_mask[..., None], oh, 0.0)
        ego = jnp.zeros((B, T, 1, label_dim), jnp.float32)
        oh_all = jnp.concatenate([ego, oh], axis=-2)
        pol_obs = jnp.concatenate([obs4, oh_all], axis=-1).reshape(B, T, -1)
        return jnp.concatenate([pol_obs, a_oh], axis=-1)

    if impl == "pallas" and labels is not None:
        # Explicit labels: the two LSTMs are independent -> single fused kernel.
        x_pol = build_pol_x(labels)
        (sup_logits, pol_logits, pis,
         sup_latent_new, latent_new) = fused_forward_pallas(
            x_sup, x_pol, sup_latent, latent, sup_params, policy_params)
    else:
        # labels=None (policy input depends on sup argmax) or reference impl.
        if impl == "pallas":
            sup_logits, _, sup_latent_new = lstm_forward_pallas(
                x_sup, sup_latent[0], sup_latent[1], sup_params,
                compute_probs=False)   # only logits/argmax are consumed
        else:
            sup_logits, _, sup_latent_new = lstm_forward_ref(
                x_sup, sup_latent[0], sup_latent[1], sup_params)
        sup_logits4 = sup_logits.reshape(B, T, label_num, label_dim)
        lab = labels if labels is not None else jnp.argmax(sup_logits4, -1)
        x_pol = build_pol_x(lab)
        if impl == "pallas":
            pol_logits, pis, latent_new = lstm_forward_pallas(
                x_pol, latent[0], latent[1], policy_params, compute_probs=True)
        else:
            pol_logits, pis, latent_new = lstm_forward_ref(
                x_pol, latent[0], latent[1], policy_params)

    sup_logits = sup_logits.reshape(B, T, label_num, label_dim)
    info = {
        "preactivation": pol_logits,
        "latent": latent_new,
        "sup_preactivation": sup_logits,
        "sup_latent": sup_latent_new,
    }
    return pis, info


# ----------------------------------------------------------------------------
# Deterministic parameter init (PyTorch-LSTM-style uniform(-1/sqrt(H), 1/sqrt(H)))
# ----------------------------------------------------------------------------
def init_lstm_params(key, in_dim, hidden, out_dim):
    ks = jax.random.split(key, 5)
    s = 1.0 / np.sqrt(hidden)
    u = lambda k, shape: jax.random.uniform(k, shape, jnp.float32, -s, s)
    return {
        "w_ih": u(ks[0], (in_dim, 4 * hidden)),
        "w_hh": u(ks[1], (hidden, 4 * hidden)),
        "b": u(ks[2], (1, 4 * hidden)),
        "w_out": u(ks[3], (hidden, out_dim)),
        "b_out": u(ks[4], (1, out_dim)),
    }


# TODO(synk): Categorical sampling / np.random action choice and the stateful
# a_p / latent_p bookkeeping in get_action have no kernel equivalent; only the
# forward pass (pis + info) is implemented here.

if __name__ == "__main__":
    key = jax.random.PRNGKey(0)
    B, T = 2, 8
    label_num, label_dim = 4, 3
    feat = 4
    obs_dim = (label_num + 1) * feat          # 20
    action_dim = 5
    hidden = 32
    TOL = 3e-2   # bf16 weights/activations on the MXU, f32 accumulation

    k_obs, k_act, k_lab, k_sup, k_pol = jax.random.split(key, 5)
    obs4 = jax.random.normal(k_obs, (B, T, label_num + 1, feat), jnp.float32)
    obs4 = obs4.at[:, :, 3, :].set(0.0)       # empty vehicle slot -> exercises valid mask
    obs_flat = obs4.reshape(B, T, obs_dim)
    prev_actions = jax.random.randint(k_act, (B, T, 1), 0, action_dim)
    given_labels = jax.random.randint(k_lab, (B, T, label_num), 0, label_dim)

    sup_params = init_lstm_params(k_sup, obs_dim + action_dim, hidden,
                                  label_num * label_dim)
    pol_in_dim = (label_num + 1) * (feat + label_dim) + action_dim   # 40
    pol_params = init_lstm_params(k_pol, pol_in_dim, hidden, action_dim)

    common = dict(label_num=label_num, label_dim=label_dim,
                  action_dim=action_dim, hidden=hidden)
    fwd_pallas = jax.jit(functools.partial(sup_sep_forward, impl="pallas", **common))
    fwd_ref = jax.jit(functools.partial(sup_sep_forward, impl="ref", **common))

    # --- labels=None path (two single-LSTM kernels; sup without softmax) -------
    pis_auto, info_auto = fwd_pallas(obs_flat, prev_actions, None,
                                     pol_params, sup_params)
    pis_auto_r, info_auto_r = fwd_ref(obs_flat, prev_actions, None,
                                      pol_params, sup_params)
    jax.block_until_ready((pis_auto, info_auto, pis_auto_r, info_auto_r))
    # sup logits don't depend on labels -> safe to compare even on this path.
    np.testing.assert_allclose(np.asarray(info_auto["sup_preactivation"]),
                               np.asarray(info_auto_r["sup_preactivation"]),
                               rtol=TOL, atol=TOL)

    # --- explicit-labels path (fused two-LSTM kernel) vs pure-JAX reference ----
    pis, info = fwd_pallas(obs_flat, prev_actions, given_labels,
                           pol_params, sup_params)
    pis_ref, info_ref = fwd_ref(obs_flat, prev_actions, given_labels,
                                pol_params, sup_params)
    jax.block_until_ready((pis, info, pis_ref, info_ref))

    np.testing.assert_allclose(np.asarray(pis), np.asarray(pis_ref),
                               rtol=TOL, atol=TOL)
    np.testing.assert_allclose(np.asarray(info["preactivation"]),
                               np.asarray(info_ref["preactivation"]),
                               rtol=TOL, atol=TOL)
    np.testing.assert_allclose(np.asarray(info["sup_preactivation"]),
                               np.asarray(info_ref["sup_preactivation"]),
                               rtol=TOL, atol=TOL)

    # --- standalone single-LSTM kernel with softmax (covers compute_probs=True)
    z = jnp.zeros((B, hidden), jnp.float32)
    x_sup_t = jnp.concatenate(
        [obs_flat, jax.nn.one_hot(prev_actions[..., 0], action_dim,
                                  dtype=jnp.float32)], axis=-1)
    lg_p, pr_p, lat_p = lstm_forward_pallas(x_sup_t, z, z, sup_params,
                                            compute_probs=True)
    lg_r, pr_r, lat_r = lstm_forward_ref(x_sup_t, z, z, sup_params)
    jax.block_until_ready((lg_p, pr_p, lat_p))
    np.testing.assert_allclose(np.asarray(lg_p), np.asarray(lg_r), rtol=TOL, atol=TOL)
    np.testing.assert_allclose(np.asarray(pr_p), np.asarray(pr_r), rtol=TOL, atol=TOL)

    assert pis.shape == (B, T, action_dim)
    assert info["sup_preactivation"].shape == (B, T, label_num, label_dim)
    assert info["latent"][0].shape == (B, hidden)
    print("KERNEL_OK")
</pallas_src>

<mosaic_0001>
module attributes {stable_mosaic.version = 11 : i64} {
  func.func @_lstm_kernel(%arg0: memref<64x25xbf16, #tpu.memory_space<vmem>>, %arg1: memref<8x32xf32, #tpu.memory_space<vmem>>, %arg2: memref<8x32xf32, #tpu.memory_space<vmem>>, %arg3: memref<25x128xbf16, #tpu.memory_space<vmem>>, %arg4: memref<32x128xbf16, #tpu.memory_space<vmem>>, %arg5: memref<1x128xf32, #tpu.memory_space<vmem>>, %arg6: memref<32x128xbf16, #tpu.memory_space<vmem>>, %arg7: memref<1x128xf32, #tpu.memory_space<vmem>>, %arg8: memref<1x128xf32, #tpu.memory_space<vmem>>, %arg9: memref<64x128xf32, #tpu.memory_space<vmem>>, %arg10: memref<8x32xf32, #tpu.memory_space<vmem>>, %arg11: memref<8x32xf32, #tpu.memory_space<vmem>>) attributes {dimension_semantics = [], scalar_prefetch = 0 : i64, scratch_operands = 0 : i64, tpu.core_type = #tpu.core_type<tc>} {
    %c0 = arith.constant 0 : index
    %c0_0 = arith.constant 0 : index
    %0 = vector.load %arg0[%c0, %c0_0] : memref<64x25xbf16, #tpu.memory_space<vmem>>, vector<64x25xbf16>
    %c0_1 = arith.constant 0 : index
    %c0_2 = arith.constant 0 : index
    %1 = vector.load %arg3[%c0_1, %c0_2] : memref<25x128xbf16, #tpu.memory_space<vmem>>, vector<25x128xbf16>
    %cst = arith.constant dense<0.000000e+00> : vector<64x128xf32>
    %2 = tpu.matmul %0, %1, %cst {dimension_numbers = #tpu.dot_dimension_numbers<[1], [0], [0], [1], [0, 0, 1, 1], [], []>} : vector<64x25xbf16>, vector<25x128xbf16>, vector<64x128xf32> -> vector<64x128xf32>
    %c0_3 = arith.constant 0 : index
    %c0_4 = arith.constant 0 : index
    %3 = vector.load %arg5[%c0_3, %c0_4] : memref<1x128xf32, #tpu.memory_space<vmem>>, vector<1x128xf32>
    %4 = vector.broadcast %3 : vector<1x128xf32> to vector<64x128xf32>
    %5 = arith.addf %2, %4 : vector<64x128xf32>
    %c0_5 = arith.constant 0 : index
    %c0_6 = arith.constant 0 : index
    %6 = vector.load %arg4[%c0_5, %c0_6] : memref<32x128xbf16, #tpu.memory_space<vmem>>, vector<32x128xbf16>
    %c0_7 = arith.constant 0 : index
    %c0_8 = arith.constant 0 : index
    %7 = vector.load %arg1[%c0_7, %c0_8] : memref<8x32xf32, #tpu.memory_space<vmem>>, vector<8x32xf32>
    %c0_9 = arith.constant 0 : index
    %c0_10 = arith.constant 0 : index
    %8 = vector.load %arg2[%c0_9, %c0_10] : memref<8x32xf32, #tpu.memory_space<vmem>>, vector<8x32xf32>
    %9 = vector.extract_strided_slice %5 {offsets = [0, 0], sizes = [8, 128], strides = [1, 1]} : vector<64x128xf32> to vector<8x128xf32>
    %10 = arith.truncf %7 : vector<8x32xf32> to vector<8x32xbf16>
    %cst_11 = arith.constant dense<0.000000e+00> : vector<8x128xf32>
    %11 = tpu.matmul %10, %6, %cst_11 {dimension_numbers = #tpu.dot_dimension_numbers<[1], [0], [0], [1], [0, 0, 1, 1], [], []>} : vector<8x32xbf16>, vector<32x128xbf16>, vector<8x128xf32> -> vector<8x128xf32>
    %12 = arith.addf %9, %11 : vector<8x128xf32>
    %13 = arith.negf %12 : vector<8x128xf32>
    %14 = math.exp %13 : vector<8x128xf32>
    %cst_12 = arith.constant 1.000000e+00 : f32
    %15 = vector.broadcast %cst_12 : f32 to vector<8x128xf32>
    %16 = arith.addf %15, %14 : vector<8x128xf32>
    %17 = arith.divf %15, %16 : vector<8x128xf32>
    %18 = math.tanh %12 : vector<8x128xf32>
    %19 = vector.extract_strided_slice %17 {offsets = [0, 32], sizes = [8, 32], strides = [1, 1]} : vector<8x128xf32> to vector<8x32xf32>
    %20 = arith.mulf %19, %8 : vector<8x32xf32>
    %21 = vector.extract_strided_slice %17 {offsets = [0, 0], sizes = [8, 32], strides = [1, 1]} : vector<8x128xf32> to vector<8x32xf32>
    %22 = vector.extract_strided_slice %18 {offsets = [0, 64], sizes = [8, 32], strides = [1, 1]} : vector<8x128xf32> to vector<8x32xf32>
    %23 = arith.mulf %21, %22 : vector<8x32xf32>
    %24 = arith.addf %20, %23 : vector<8x32xf32>
    %25 = vector.extract_strided_slice %17 {offsets = [0, 96], sizes = [8, 32], strides = [1, 1]} : vector<8x128xf32> to vector<8x32xf32>
    %26 = math.tanh %24 : vector<8x32xf32>
    %27 = arith.mulf %25, %26 : vector<8x32xf32>
    %28 = vector.extract_strided_slice %5 {offsets = [8, 0], sizes = [8, 128], strides = [1, 1]} : vector<64x128xf32> to vector<8x128xf32>
    %29 = arith.truncf %27 : vector<8x32xf32> to vector<8x32xbf16>
    %cst_13 = arith.constant dense<0.000000e+00> : vector<8x128xf32>
    %30 = tpu.matmul %29, %6, %cst_13 {dimension_numbers = #tpu.dot_dimension_numbers<[1], [0], [0], [1], [0, 0, 1, 1], [], []>} : vector<8x32xbf16>, vector<32x128xbf16>, vector<8x128xf32> -> vector<8x128xf32>
    %31 = arith.addf %28, %30 : vector<8x128xf32>
    %32 = arith.negf %31 : vector<8x128xf32>
    %33 = math.exp %32 : vector<8x128xf32>
    %cst_14 = arith.constant 1.000000e+00 : f32
    %34 = vector.broadcast %cst_14 : f32 to vector<8x128xf32>
    %35 = arith.addf %34, %33 : vector<8x128xf32>
    %36 = arith.divf %34, %35 : vector<8x128xf32>
    %37 = math.tanh %31 : vector<8x128xf32>
    %38 = vector.extract_strided_slice %36 {offsets = [0, 32], sizes = [8, 32], strides = [1, 1]} : vector<8x128xf32> to vector<8x32xf32>
    %39 = arith.mulf %38, %24 : vector<8x32xf32>
    %40 = vector.extract_strided_slice %36 {offsets = [0, 0], sizes = [8, 32], strides = [1, 1]} : vector<8x128xf32> to vector<8x32xf32>
    %41 = vector.extract_strided_slice %37 {offsets = [0, 64], sizes = [8, 32], strides = [1, 1]} : vector<8x128xf32> to vector<8x32xf32>
    %42 = arith.mulf %40, %41 : vector<8x32xf32>
    %43 = arith.addf %39, %42 : vector<8x32xf32>
    %44 = vector.extract_strided_slice %36 {offsets = [0, 96], sizes = [8, 32], strides = [1, 1]} : vector<8x128xf32> to vector<8x32xf32>
    %45 = math.tanh %43 : vector<8x32xf32>
    %46 = arith.mulf %44, %45 : vector<8x32xf32>
    %47 = vector.extract_strided_slice %5 {offsets = [16, 0], sizes = [8, 128], strides = [1, 1]} : vector<64x128xf32> to vector<8x128xf32>
    %48 = arith.truncf %46 : vector<8x32xf32> to vector<8x32xbf16>
    %cst_15 = arith.constant dense<0.000000e+00> : vector<8x128xf32>
    %49 = tpu.matmul %48, %6, %cst_15 {dimension_numbers = #tpu.dot_dimension_numbers<[1], [0], [0], [1], [0, 0, 1, 1], [], []>} : vector<8x32xbf16>, vector<32x128xbf16>, vector<8x128xf32> -> vector<8x128xf32>
    %50 = arith.addf %47, %49 : vector<8x128xf32>
    %51 = arith.negf %50 : vector<8x128xf32>
    %52 = math.exp %51 : vector<8x128xf32>
    %cst_16 = arith.constant 1.000000e+00 : f32
    %53 = vector.broadcast %cst_16 : f32 to vector<8x128xf32>
    %54 = arith.addf %53, %52 : vector<8x128xf32>
    %55 = arith.divf %53, %54 : vector<8x128xf32>
    %56 = math.tanh %50 : vector<8x128xf32>
    %57 = vector.extract_strided_slice %55 {offsets = [0, 32], sizes = [8, 32], strides = [1, 1]} : vector<8x128xf32> to vector<8x32xf32>
    %58 = arith.mulf %57, %43 : vector<8x32xf32>
    %59 = vector.extract_strided_slice %55 {offsets = [0, 0], sizes = [8, 32], strides = [1, 1]} : vector<8x128xf32> to vector<8x32xf32>
    %60 = vector.extract_strided_slice %56 {offsets = [0, 64], sizes = [8, 32], strides = [1, 1]} : vector<8x128xf32> to vector<8x32xf32>
    %61 = arith.mulf %59, %60 : vector<8x32xf32>
    %62 = arith.addf %58, %61 : vector<8x32xf32>
    %63 = vector.extract_strided_slice %55 {offsets = [0, 96], sizes = [8, 32], strides = [1, 1]} : vector<8x128xf32> to vector<8x32xf32>
    %64 = math.tanh %62 : vector<8x32xf32>
    %65 = arith.mulf %63, %64 : vector<8x32xf32>
    %66 = vector.extract_strided_slice %5 {offsets = [24, 0], sizes = [8, 128], strides = [1, 1]} : vector<64x128xf32> to vector<8x128xf32>
    %67 = arith.truncf %65 : vector<8x32xf32> to vector<8x32xbf16>
    %cst_17 = arith.constant dense<0.000000e+00> : vector<8x128xf32>
    %68 = tpu.matmul %67, %6, %cst_17 {dimension_numbers = #tpu.dot_dimension_numbers<[1], [0], [0], [1], [0, 0, 1, 1], [], []>} : vector<8x32xbf16>, vector<32x128xbf16>, vector<8x128xf32> -> vector<8x128xf32>
    %69 = arith.addf %66, %68 : vector<8x128xf32>
    %70 = arith.negf %69 : vector<8x128xf32>
    %71 = math.exp %70 : vector<8x128xf32>
    %cst_18 = arith.constant 1.000000e+00 : f32
    %72 = vector.broadcast %cst_18 : f32 to vector<8x128xf32>
    %73 = arith.addf %72, %71 : vector<8x128xf32>
    %74 = arith.divf %72, %73 : vector<8x128xf32>
    %75 = math.tanh %69 : vector<8x128xf32>
    %76 = vector.extract_strided_slice %74 {offsets = [0, 32], sizes = [8, 32], strides = [1, 1]} : vector<8x128xf32> to vector<8x32xf32>
    %77 = arith.mulf %76, %62 : vector<8x32xf32>
    %78 = vector.extract_strided_slice %74 {offsets = [0, 0], sizes = [8, 32], strides = [1, 1]} : vector<8x128xf32> to vector<8x32xf32>
    %79 = vector.extract_strided_slice %75 {offsets = [0, 64], sizes = [8, 32], strides = [1, 1]} : vector<8x128xf32> to vector<8x32xf32>
    %80 = arith.mulf %78, %79 : vector<8x32xf32>
    %81 = arith.addf %77, %80 : vector<8x32xf32>
    %82 = vector.extract_strided_slice %74 {offsets = [0, 96], sizes = [8, 32], strides = [1, 1]} : vector<8x128xf32> to vector<8x32xf32>
    %83 = math.tanh %81 : vector<8x32xf32>
    %84 = arith.mulf %82, %83 : vector<8x32xf32>
    %85 = vector.extract_strided_slice %5 {offsets = [32, 0], sizes = [8, 128], strides = [1, 1]} : vector<64x128xf32> to vector<8x128xf32>
    %86 = arith.truncf %84 : vector<8x32xf32> to vector<8x32xbf16>
    %cst_19 = arith.constant dense<0.000000e+00> : vector<8x128xf32>
    %87 = tpu.matmul %86, %6, %cst_19 {dimension_numbers = #tpu.dot_dimension_numbers<[1], [0], [0], [1], [0, 0, 1, 1], [], []>} : vector<8x32xbf16>, vector<32x128xbf16>, vector<8x128xf32> -> vector<8x128xf32>
    %88 = arith.addf %85, %87 : vector<8x128xf32>
    %89 = arith.negf %88 : vector<8x128xf32>
    %90 = math.exp %89 : vector<8x128xf32>
    %cst_20 = arith.constant 1.000000e+00 : f32
    %91 = vector.broadcast %cst_20 : f32 to vector<8x128xf32>
    %92 = arith.addf %91, %90 : vector<8x128xf32>
    %93 = arith.divf %91, %92 : vector<8x128xf32>
    %94 = math.tanh %88 : vector<8x128xf32>
    %95 = vector.extract_strided_slice %93 {offsets = [0, 32], sizes = [8, 32], strides = [1, 1]} : vector<8x128xf32> to vector<8x32xf32>
    %96 = arith.mulf %95, %81 : vector<8x32xf32>
    %97 = vector.extract_strided_slice %93 {offsets = [0, 0], sizes = [8, 32], strides = [1, 1]} : vector<8x128xf32> to vector<8x32xf32>
    %98 = vector.extract_strided_slice %94 {offsets = [0, 64], sizes = [8, 32], strides = [1, 1]} : vector<8x128xf32> to vector<8x32xf32>
    %99 = arith.mulf %97, %98 : vector<8x32xf32>
    %100 = arith.addf %96, %99 : vector<8x32xf32>
    %101 = vector.extract_strided_slice %93 {offsets = [0, 96], sizes = [8, 32], strides = [1, 1]} : vector<8x128xf32> to vector<8x32xf32>
    %102 = math.tanh %100 : vector<8x32xf32>
    %103 = arith.mulf %101, %102 : vector<8x32xf32>
    %104 = vector.extract_strided_slice %5 {offsets = [40, 0], sizes = [8, 128], strides = [1, 1]} : vector<64x128xf32> to vector<8x128xf32>
    %105 = arith.truncf %103 : vector<8x32xf32> to vector<8x32xbf16>
    %cst_21 = arith.constant dense<0.000000e+00> : vector<8x128xf32>
    %106 = tpu.matmul %105, %6, %cst_21 {dimension_numbers = #tpu.dot_dimension_numbers<[1], [0], [0], [1], [0, 0, 1, 1], [], []>} : vector<8x32xbf16>, vector<32x128xbf16>, vector<8x128xf32> -> vector<8x128xf32>
    %107 = arith.addf %104, %106 : vector<8x128xf32>
    %108 = arith.negf %107 : vector<8x128xf32>
    %109 = math.exp %108 : vector<8x128xf32>
    %cst_22 = arith.constant 1.000000e+00 : f32
    %110 = vector.broadcast %cst_22 : f32 to vector<8x128xf32>
    %111 = arith.addf %110, %109 : vector<8x128xf32>
    %112 = arith.divf %110, %111 : vector<8x128xf32>
    %113 = math.tanh %107 : vector<8x128xf32>
    %114 = vector.extract_strided_slice %112 {offsets = [0, 32], sizes = [8, 32], strides = [1, 1]} : vector<8x128xf32> to vector<8x32xf32>
    %115 = arith.mulf %114, %100 : vector<8x32xf32>
    %116 = vector.extract_strided_slice %112 {offsets = [0, 0], sizes = [8, 32], strides = [1, 1]} : vector<8x128xf32> to vector<8x32xf32>
    %117 = vector.extract_strided_slice %113 {offsets = [0, 64], sizes = [8, 32], strides = [1, 1]} : vector<8x128xf32> to vector<8x32xf32>
    %118 = arith.mulf %116, %117 : vector<8x32xf32>
    %119 = arith.addf %115, %118 : vector<8x32xf32>
    %120 = vector.extract_strided_slice %112 {offsets = [0, 96], sizes = [8, 32], strides = [1, 1]} : vector<8x128xf32> to vector<8x32xf32>
    %121 = math.tanh %119 : vector<8x32xf32>
    %122 = arith.mulf %120, %121 : vector<8x32xf32>
    %123 = vector.extract_strided_slice %5 {offsets = [48, 0], sizes = [8, 128], strides = [1, 1]} : vector<64x128xf32> to vector<8x128xf32>
    %124 = arith.truncf %122 : vector<8x32xf32> to vector<8x32xbf16>
    %cst_23 = arith.constant dense<0.000000e+00> : vector<8x128xf32>
    %125 = tpu.matmul %124, %6, %cst_23 {dimension_numbers = #tpu.dot_dimension_numbers<[1], [0], [0], [1], [0, 0, 1, 1], [], []>} : vector<8x32xbf16>, vector<32x128xbf16>, vector<8x128xf32> -> vector<8x128xf32>
    %126 = arith.addf %123, %125 : vector<8x128xf32>
    %127 = arith.negf %126 : vector<8x128xf32>
    %128 = math.exp %127 : vector<8x128xf32>
    %cst_24 = arith.constant 1.000000e+00 : f32
    %129 = vector.broadcast %cst_24 : f32 to vector<8x128xf32>
    %130 = arith.addf %129, %128 : vector<8x128xf32>
    %131 = arith.divf %129, %130 : vector<8x128xf32>
    %132 = math.tanh %126 : vector<8x128xf32>
    %133 = vector.extract_strided_slice %131 {offsets = [0, 32], sizes = [8, 32], strides = [1, 1]} : vector<8x128xf32> to vector<8x32xf32>
    %134 = arith.mulf %133, %119 : vector<8x32xf32>
    %135 = vector.extract_strided_slice %131 {offsets = [0, 0], sizes = [8, 32], strides = [1, 1]} : vector<8x128xf32> to vector<8x32xf32>
    %136 = vector.extract_strided_slice %132 {offsets = [0, 64], sizes = [8, 32], strides = [1, 1]} : vector<8x128xf32> to vector<8x32xf32>
    %137 = arith.mulf %135, %136 : vector<8x32xf32>
    %138 = arith.addf %134, %137 : vector<8x32xf32>
    %139 = vector.extract_strided_slice %131 {offsets = [0, 96], sizes = [8, 32], strides = [1, 1]} : vector<8x128xf32> to vector<8x32xf32>
    %140 = math.tanh %138 : vector<8x32xf32>
    %141 = arith.mulf %139, %140 : vector<8x32xf32>
    %142 = vector.extract_strided_slice %5 {offsets = [56, 0], sizes = [8, 128], strides = [1, 1]} : vector<64x128xf32> to vector<8x128xf32>
    %143 = arith.truncf %141 : vector<8x32xf32> to vector<8x32xbf16>
    %cst_25 = arith.constant dense<0.000000e+00> : vector<8x128xf32>
    %144 = tpu.matmul %143, %6, %cst_25 {dimension_numbers = #tpu.dot_dimension_numbers<[1], [0], [0], [1], [0, 0, 1, 1], [], []>} : vector<8x32xbf16>, vector<32x128xbf16>, vector<8x128xf32> -> vector<8x128xf32>
    %145 = arith.addf %142, %144 : vector<8x128xf32>
    %146 = arith.negf %145 : vector<8x128xf32>
    %147 = math.exp %146 : vector<8x128xf32>
    %cst_26 = arith.constant 1.000000e+00 : f32
    %148 = vector.broadcast %cst_26 : f32 to vector<8x128xf32>
    %149 = arith.addf %148, %147 : vector<8x128xf32>
    %150 = arith.divf %148, %149 : vector<8x128xf32>
    %151 = math.tanh %145 : vector<8x128xf32>
    %152 = vector.extract_strided_slice %150 {offsets = [0, 32], sizes = [8, 32], strides = [1, 1]} : vector<8x128xf32> to vector<8x32xf32>
    %153 = arith.mulf %152, %138 : vector<8x32xf32>
    %154 = vector.extract_strided_slice %150 {offsets = [0, 0], sizes = [8, 32], strides = [1, 1]} : vector<8x128xf32> to vector<8x32xf32>
    %155 = vector.extract_strided_slice %151 {offsets = [0, 64], sizes = [8, 32], strides = [1, 1]} : vector<8x128xf32> to vector<8x32xf32>
    %156 = arith.mulf %154, %155 : vector<8x32xf32>
    %157 = arith.addf %153, %156 : vector<8x32xf32>
    %158 = vector.extract_strided_slice %150 {offsets = [0, 96], sizes = [8, 32], strides = [1, 1]} : vector<8x128xf32> to vector<8x32xf32>
    %159 = math.tanh %157 : vector<8x32xf32>
    %160 = arith.mulf %158, %159 : vector<8x32xf32>
    %161 = tpu.concatenate %27, %46, %65, %84, %103, %122, %141, %160 in 0 : vector<8x32xf32>, vector<8x32xf32>, vector<8x32xf32>, vector<8x32xf32>, vector<8x32xf32>, vector<8x32xf32>, vector<8x32xf32>, vector<8x32xf32> -> vector<64x32xf32>
    %162 = arith.truncf %161 : vector<64x32xf32> to vector<64x32xbf16>
    %c0_27 = arith.constant 0 : index
    %c0_28 = arith.constant 0 : index
    %163 = vector.load %arg6[%c0_27, %c0_28] : memref<32x128xbf16, #tpu.memory_space<vmem>>, vector<32x128xbf16>
    %cst_29 = arith.constant dense<0.000000e+00> : vector<64x128xf32>
    %164 = tpu.matmul %162, %163, %cst_29 {dimension_numbers = #tpu.dot_dimension_numbers<[1], [0], [0], [1], [0, 0, 1, 1], [], []>} : vector<64x32xbf16>, vector<32x128xbf16>, vector<64x128xf32> -> vector<64x128xf32>
    %c0_30 = arith.constant 0 : index
    %c0_31 = arith.constant 0 : index
    %165 = vector.load %arg7[%c0_30, %c0_31] : memref<1x128xf32, #tpu.memory_space<vmem>>, vector<1x128xf32>
    %166 = vector.broadcast %165 : vector<1x128xf32> to vector<64x128xf32>
    %167 = arith.addf %164, %166 : vector<64x128xf32>
    %c0_32 = arith.constant 0 : index
    %c0_33 = arith.constant 0 : index
    %168 = vector.load %arg9[%c0_32, %c0_33] : memref<64x128xf32, #tpu.memory_space<vmem>>, vector<64x128xf32>
    tpu.vector_store %arg9[%c0_32, %c0_33], %167 {strides = array<i32>} : memref<64x128xf32, #tpu.memory_space<vmem>>, vector<64x128xf32>,
    %c0_34 = arith.constant 0 : index
    %c0_35 = arith.constant 0 : index
    %169 = vector.load %arg10[%c0_34, %c0_35] : memref<8x32xf32, #tpu.memory_space<vmem>>, vector<8x32xf32>
    tpu.vector_store %arg10[%c0_34, %c0_35], %160 {strides = array<i32>} : memref<8x32xf32, #tpu.memory_space<vmem>>, vector<8x32xf32>,
    %c0_36 = arith.constant 0 : index
    %c0_37 = arith.constant 0 : index
    %170 = vector.load %arg11[%c0_36, %c0_37] : memref<8x32xf32, #tpu.memory_space<vmem>>, vector<8x32xf32>
    tpu.vector_store %arg11[%c0_36, %c0_37], %157 {strides = array<i32>} : memref<8x32xf32, #tpu.memory_space<vmem>>, vector<8x32xf32>,
    return
  }
}

module attributes {stable_mosaic.version = 11 : i64} {
  func.func @_lstm_kernel(%arg0: memref<64x40xbf16, #tpu.memory_space<vmem>>, %arg1: memref<8x32xf32, #tpu.memory_space<vmem>>, %arg2: memref<8x32xf32, #tpu.memory_space<vmem>>, %arg3: memref<40x128xbf16, #tpu.memory_space<vmem>>, %arg4: memref<32x128xbf16, #tpu.memory_space<vmem>>, %arg5: memref<1x128xf32, #tpu.memory_space<vmem>>, %arg6: memref<32x128xbf16, #tpu.memory_space<vmem>>, %arg7: memref<1x128xf32, #tpu.memory_space<vmem>>, %arg8: memref<1x128xf32, #tpu.memory_space<vmem>>, %arg9: memref<64x128xf32, #tpu.memory_space<vmem>>, %arg10: memref<64x128xf32, #tpu.memory_space<vmem>>, %arg11: memref<8x32xf32, #tpu.memory_space<vmem>>, %arg12: memref<8x32xf32, #tpu.memory_space<vmem>>) attributes {dimension_semantics = [], scalar_prefetch = 0 : i64, scratch_operands = 0 : i64, tpu.core_type = #tpu.core_type<tc>} {
    %c0 = arith.constant 0 : index
    %c0_0 = arith.constant 0 : index
    %0 = vector.load %arg0[%c0, %c0_0] : memref<64x40xbf16, #tpu.memory_space<vmem>>, vector<64x40xbf16>
    %c0_1 = arith.constant 0 : index
    %c0_2 = arith.constant 0 : index
    %1 = vector.load %arg3[%c0_1, %c0_2] : memref<40x128xbf16, #tpu.memory_space<vmem>>, vector<40x128xbf16>
    %cst = arith.constant dense<0.000000e+00> : vector<64x128xf32>
    %2 = tpu.matmul %0, %1, %cst {dimension_numbers = #tpu.dot_dimension_numbers<[1], [0], [0], [1], [0, 0, 1, 1], [], []>} : vector<64x40xbf16>, vector<40x128xbf16>, vector<64x128xf32> -> vector<64x128xf32>
    %c0_3 = arith.constant 0 : index
    %c0_4 = arith.constant 0 : index
    %3 = vector.load %arg5[%c0_3, %c0_4] : memref<1x128xf32, #tpu.memory_space<vmem>>, vector<1x128xf32>
    %4 = vector.broadcast %3 : vector<1x128xf32> to vector<64x128xf32>
    %5 = arith.addf %2, %4 : vector<64x128xf32>
    %c0_5 = arith.constant 0 : index
    %c0_6 = arith.constant 0 : index
    %6 = vector.load %arg4[%c0_5, %c0_6] : memref<32x128xbf16, #tpu.memory_space<vmem>>, vector<32x128xbf16>
    %c0_7 = arith.constant 0 : index
    %c0_8 = arith.constant 0 : index
    %7 = vector.load %arg1[%c0_7, %c0_8] : memref<8x32xf32, #tpu.memory_space<vmem>>, vector<8x32xf32>
    %c0_9 = arith.constant 0 : index
    %c0_10 = arith.constant 0 : index
    %8 = vector.load %arg2[%c0_9, %c0_10] : memref<8x32xf32, #tpu.memory_space<vmem>>, vector<8x32xf32>
    %9 = vector.extract_strided_slice %5 {offsets = [0, 0], sizes = [8, 128], strides = [1, 1]} : vector<64x128xf32> to vector<8x128xf32>
    %10 = arith.truncf %7 : vector<8x32xf32> to vector<8x32xbf16>
    %cst_11 = arith.constant dense<0.000000e+00> : vector<8x128xf32>
    %11 = tpu.matmul %10, %6, %cst_11 {dimension_numbers = #tpu.dot_dimension_numbers<[1], [0], [0], [1], [0, 0, 1, 1], [], []>} : vector<8x32xbf16>, vector<32x128xbf16>, vector<8x128xf32> -> vector<8x128xf32>
    %12 = arith.addf %9, %11 : vector<8x128xf32>
    %13 = arith.negf %12 : vector<8x128xf32>
    %14 = math.exp %13 : vector<8x128xf32>
    %cst_12 = arith.constant 1.000000e+00 : f32
    %15 = vector.broadcast %cst_12 : f32 to vector<8x128xf32>
    %16 = arith.addf %15, %14 : vector<8x128xf32>
    %17 = arith.divf %15, %16 : vector<8x128xf32>
    %18 = math.tanh %12 : vector<8x128xf32>
    %19 = vector.extract_strided_slice %17 {offsets = [0, 32], sizes = [8, 32], strides = [1, 1]} : vector<8x128xf32> to vector<8x32xf32>
    %20 = arith.mulf %19, %8 : vector<8x32xf32>
    %21 = vector.extract_strided_slice %17 {offsets = [0, 0], sizes = [8, 32], strides = [1, 1]} : vector<8x128xf32> to vector<8x32xf32>
    %22 = vector.extract_strided_slice %18 {offsets = [0, 64], sizes = [8, 32], strides = [1, 1]} : vector<8x128xf32> to vector<8x32xf32>
    %23 = arith.mulf %21, %22 : vector<8x32xf32>
    %24 = arith.addf %20, %23 : vector<8x32xf32>
    %25 = vector.extract_strided_slice %17 {offsets = [0, 96], sizes = [8, 32], strides = [1, 1]} : vector<8x128xf32> to vector<8x32xf32>
    %26 = math.tanh %24 : vector<8x32xf32>
    %27 = arith.mulf %25, %26 : vector<8x32xf32>
    %28 = vector.extract_strided_slice %5 {offsets = [8, 0], sizes = [8, 128], strides = [1, 1]} : vector<64x128xf32> to vector<8x128xf32>
    %29 = arith.truncf %27 : vector<8x32xf32> to vector<8x32xbf16>
    %cst_13 = arith.constant dense<0.000000e+00> : vector<8x128xf32>
    %30 = tpu.matmul %29, %6, %cst_13 {dimension_numbers = #tpu.dot_dimension_numbers<[1], [0], [0], [1], [0, 0, 1, 1], [], []>} : vector<8x32xbf16>, vector<32x128xbf16>, vector<8x128xf32> -> vector<8x128xf32>
    %31 = arith.addf %28, %30 : vector<8x128xf32>
    %32 = arith.negf %31 : vector<8x128xf32>
    %33 = math.exp %32 : vector<8x128xf32>
    %cst_14 = arith.constant 1.000000e+00 : f32
    %34 = vector.broadcast %cst_14 : f32 to vector<8x128xf32>
    %35 = arith.addf %34, %33 : vector<8x128xf32>
    %36 = arith.divf %34, %35 : vector<8x128xf32>
    %37 = math.tanh %31 : vector<8x128xf32>
    %38 = vector.extract_strided_slice %36 {offsets = [0, 32], sizes = [8, 32], strides = [1, 1]} : vector<8x128xf32> to vector<8x32xf32>
    %39 = arith.mulf %38, %24 : vector<8x32xf32>
    %40 = vector.extract_strided_slice %36 {offsets = [0, 0], sizes = [8, 32], strides = [1, 1]} : vector<8x128xf32> to vector<8x32xf32>
    %41 = vector.extract_strided_slice %37 {offsets = [0, 64], sizes = [8, 32], strides = [1, 1]} : vector<8x128xf32> to vector<8x32xf32>
    %42 = arith.mulf %40, %41 : vector<8x32xf32>
    %43 = arith.addf %39, %42 : vector<8x32xf32>
    %44 = vector.extract_strided_slice %36 {offsets = [0, 96], sizes = [8, 32], strides = [1, 1]} : vector<8x128xf32> to vector<8x32xf32>
    %45 = math.tanh %43 : vector<8x32xf32>
    %46 = arith.mulf %44, %45 : vector<8x32xf32>
    %47 = vector.extract_strided_slice %5 {offsets = [16, 0], sizes = [8, 128], strides = [1, 1]} : vector<64x128xf32> to vector<8x128xf32>
    %48 = arith.truncf %46 : vector<8x32xf32> to vector<8x32xbf16>
    %cst_15 = arith.constant dense<0.000000e+00> : vector<8x128xf32>
    %49 = tpu.matmul %48, %6, %cst_15 {dimension_numbers = #tpu.dot_dimension_numbers<[1], [0], [0], [1], [0, 0, 1, 1], [], []>} : vector<8x32xbf16>, vector<32x128xbf16>, vector<8x128xf32> -> vector<8x128xf32>
    %50 = arith.addf %47, %49 : vector<8x128xf32>
    %51 = arith.negf %50 : vector<8x128xf32>
    %52 = math.exp %51 : vector<8x128xf32>
    %cst_16 = arith.constant 1.000000e+00 : f32
    %53 = vector.broadcast %cst_16 : f32 to vector<8x128xf32>
    %54 = arith.addf %53, %52 : vector<8x128xf32>
    %55 = arith.divf %53, %54 : vector<8x128xf32>
    %56 = math.tanh %50 : vector<8x128xf32>
    %57 = vector.extract_strided_slice %55 {offsets = [0, 32], sizes = [8, 32], strides = [1, 1]} : vector<8x128xf32> to vector<8x32xf32>
    %58 = arith.mulf %57, %43 : vector<8x32xf32>
    %59 = vector.extract_strided_slice %55 {offsets = [0, 0], sizes = [8, 32], strides = [1, 1]} : vector<8x128xf32> to vector<8x32xf32>
    %60 = vector.extract_strided_slice %56 {offsets = [0, 64], sizes = [8, 32], strides = [1, 1]} : vector<8x128xf32> to vector<8x32xf32>
    %61 = arith.mulf %59, %60 : vector<8x32xf32>
    %62 = arith.addf %58, %61 : vector<8x32xf32>
    %63 = vector.extract_strided_slice %55 {offsets = [0, 96], sizes = [8, 32], strides = [1, 1]} : vector<8x128xf32> to vector<8x32xf32>
    %64 = math.tanh %62 : vector<8x32xf32>
    %65 = arith.mulf %63, %64 : vector<8x32xf32>
    %66 = vector.extract_strided_slice %5 {offsets = [24, 0], sizes = [8, 128], strides = [1, 1]} : vector<64x128xf32> to vector<8x128xf32>
    %67 = arith.truncf %65 : vector<8x32xf32> to vector<8x32xbf16>
    %cst_17 = arith.constant dense<0.000000e+00> : vector<8x128xf32>
    %68 = tpu.matmul %67, %6, %cst_17 {dimension_numbers = #tpu.dot_dimension_numbers<[1], [0], [0], [1], [0, 0, 1, 1], [], []>} : vector<8x32xbf16>, vector<32x128xbf16>, vector<8x128xf32> -> vector<8x128xf32>
    %69 = arith.addf %66, %68 : vector<8x128xf32>
    %70 = arith.negf %69 : vector<8x128xf32>
    %71 = math.exp %70 : vector<8x128xf32>
    %cst_18 = arith.constant 1.000000e+00 : f32
    %72 = vector.broadcast %cst_18 : f32 to vector<8x128xf32>
    %73 = arith.addf %72, %71 : vector<8x128xf32>
    %74 = arith.divf %72, %73 : vector<8x128xf32>
    %75 = math.tanh %69 : vector<8x128xf32>
    %76 = vector.extract_strided_slice %74 {offsets = [0, 32], sizes = [8, 32], strides = [1, 1]} : vector<8x128xf32> to vector<8x32xf32>
    %77 = arith.mulf %76, %62 : vector<8x32xf32>
    %78 = vector.extract_strided_slice %74 {offsets = [0, 0], sizes = [8, 32], strides = [1, 1]} : vector<8x128xf32> to vector<8x32xf32>
    %79 = vector.extract_strided_slice %75 {offsets = [0, 64], sizes = [8, 32], strides = [1, 1]} : vector<8x128xf32> to vector<8x32xf32>
    %80 = arith.mulf %78, %79 : vector<8x32xf32>
    %81 = arith.addf %77, %80 : vector<8x32xf32>
    %82 = vector.extract_strided_slice %74 {offsets = [0, 96], sizes = [8, 32], strides = [1, 1]} : vector<8x128xf32> to vector<8x32xf32>
    %83 = math.tanh %81 : vector<8x32xf32>
    %84 = arith.mulf %82, %83 : vector<8x32xf32>
    %85 = vector.extract_strided_slice %5 {offsets = [32, 0], sizes = [8, 128], strides = [1, 1]} : vector<64x128xf32> to vector<8x128xf32>
    %86 = arith.truncf %84 : vector<8x32xf32> to vector<8x32xbf16>
    %cst_19 = arith.constant dense<0.000000e+00> : vector<8x128xf32>
    %87 = tpu.matmul %86, %6, %cst_19 {dimension_numbers = #tpu.dot_dimension_numbers<[1], [0], [0], [1], [0, 0, 1, 1], [], []>} : vector<8x32xbf16>, vector<32x128xbf16>, vector<8x128xf32> -> vector<8x128xf32>
    %88 = arith.addf %85, %87 : vector<8x128xf32>
    %89 = arith.negf %88 : vector<8x128xf32>
    %90 = math.exp %89 : vector<8x128xf32>
    %cst_20 = arith.constant 1.000000e+00 : f32
    %91 = vector.broadcast %cst_20 : f32 to vector<8x128xf32>
    %92 = arith.addf %91, %90 : vector<8x128xf32>
    %93 = arith.divf %91, %92 : vector<8x128xf32>
    %94 = math.tanh %88 : vector<8x128xf32>
    %95 = vector.extract_strided_slice %93 {offsets = [0, 32], sizes = [8, 32], strides = [1, 1]} : vector<8x128xf32> to vector<8x32xf32>
    %96 = arith.mulf %95, %81 : vector<8x32xf32>
    %97 = vector.extract_strided_slice %93 {offsets = [0, 0], sizes = [8, 32], strides = [1, 1]} : vector<8x128xf32> to vector<8x32xf32>
    %98 = vector.extract_strided_slice %94 {offsets = [0, 64], sizes = [8, 32], strides = [1, 1]} : vector<8x128xf32> to vector<8x32xf32>
    %99 = arith.mulf %97, %98 : vector<8x32xf32>
    %100 = arith.addf %96, %99 : vector<8x32xf32>
    %101 = vector.extract_strided_slice %93 {offsets = [0, 96], sizes = [8, 32], strides = [1, 1]} : vector<8x128xf32> to vector<8x32xf32>
    %102 = math.tanh %100 : vector<8x32xf32>
    %103 = arith.mulf %101, %102 : vector<8x32xf32>
    %104 = vector.extract_strided_slice %5 {offsets = [40, 0], sizes = [8, 128], strides = [1, 1]} : vector<64x128xf32> to vector<8x128xf32>
    %105 = arith.truncf %103 : vector<8x32xf32> to vector<8x32xbf16>
    %cst_21 = arith.constant dense<0.000000e+00> : vector<8x128xf32>
    %106 = tpu.matmul %105, %6, %cst_21 {dimension_numbers = #tpu.dot_dimension_numbers<[1], [0], [0], [1], [0, 0, 1, 1], [], []>} : vector<8x32xbf16>, vector<32x128xbf16>, vector<8x128xf32> -> vector<8x128xf32>
    %107 = arith.addf %104, %106 : vector<8x128xf32>
    %108 = arith.negf %107 : vector<8x128xf32>
    %109 = math.exp %108 : vector<8x128xf32>
    %cst_22 = arith.constant 1.000000e+00 : f32
    %110 = vector.broadcast %cst_22 : f32 to vector<8x128xf32>
    %111 = arith.addf %110, %109 : vector<8x128xf32>
    %112 = arith.divf %110, %111 : vector<8x128xf32>
    %113 = math.tanh %107 : vector<8x128xf32>
    %114 = vector.extract_strided_slice %112 {offsets = [0, 32], sizes = [8, 32], strides = [1, 1]} : vector<8x128xf32> to vector<8x32xf32>
    %115 = arith.mulf %114, %100 : vector<8x32xf32>
    %116 = vector.extract_strided_slice %112 {offsets = [0, 0], sizes = [8, 32], strides = [1, 1]} : vector<8x128xf32> to vector<8x32xf32>
    %117 = vector.extract_strided_slice %113 {offsets = [0, 64], sizes = [8, 32], strides = [1, 1]} : vector<8x128xf32> to vector<8x32xf32>
    %118 = arith.mulf %116, %117 : vector<8x32xf32>
    %119 = arith.addf %115, %118 : vector<8x32xf32>
    %120 = vector.extract_strided_slice %112 {offsets = [0, 96], sizes = [8, 32], strides = [1, 1]} : vector<8x128xf32> to vector<8x32xf32>
    %121 = math.tanh %119 : vector<8x32xf32>
    %122 = arith.mulf %120, %121 : vector<8x32xf32>
    %123 = vector.extract_strided_slice %5 {offsets = [48, 0], sizes = [8, 128], strides = [1, 1]} : vector<64x128xf32> to vector<8x128xf32>
    %124 = arith.truncf %122 : vector<8x32xf32> to vector<8x32xbf16>
    %cst_23 = arith.constant dense<0.000000e+00> : vector<8x128xf32>
    %125 = tpu.matmul %124, %6, %cst_23 {dimension_numbers = #tpu.dot_dimension_numbers<[1], [0], [0], [1], [0, 0, 1, 1], [], []>} : vector<8x32xbf16>, vector<32x128xbf16>, vector<8x128xf32> -> vector<8x128xf32>
    %126 = arith.addf %123, %125 : vector<8x128xf32>
    %127 = arith.negf %126 : vector<8x128xf32>
    %128 = math.exp %127 : vector<8x128xf32>
    %cst_24 = arith.constant 1.000000e+00 : f32
    %129 = vector.broadcast %cst_24 : f32 to vector<8x128xf32>
    %130 = arith.addf %129, %128 : vector<8x128xf32>
    %131 = arith.divf %129, %130 : vector<8x128xf32>
    %132 = math.tanh %126 : vector<8x128xf32>
    %133 = vector.extract_strided_slice %131 {offsets = [0, 32], sizes = [8, 32], strides = [1, 1]} : vector<8x128xf32> to vector<8x32xf32>
    %134 = arith.mulf %133, %119 : vector<8x32xf32>
    %135 = vector.extract_strided_slice %131 {offsets = [0, 0], sizes = [8, 32], strides = [1, 1]} : vector<8x128xf32> to vector<8x32xf32>
    %136 = vector.extract_strided_slice %132 {offsets = [0, 64], sizes = [8, 32], strides = [1, 1]} : vector<8x128xf32> to vector<8x32xf32>
    %137 = arith.mulf %135, %136 : vector<8x32xf32>
    %138 = arith.addf %134, %137 : vector<8x32xf32>
    %139 = vector.extract_strided_slice %131 {offsets = [0, 96], sizes = [8, 32], strides = [1, 1]} : vector<8x128xf32> to vector<8x32xf32>
    %140 = math.tanh %138 : vector<8x32xf32>
    %141 = arith.mulf %139, %140 : vector<8x32xf32>
    %142 = vector.extract_strided_slice %5 {offsets = [56, 0], sizes = [8, 128], strides = [1, 1]} : vector<64x128xf32> to vector<8x128xf32>
    %143 = arith.truncf %141 : vector<8x32xf32> to vector<8x32xbf16>
    %cst_25 = arith.constant dense<0.000000e+00> : vector<8x128xf32>
    %144 = tpu.matmul %143, %6, %cst_25 {dimension_numbers = #tpu.dot_dimension_numbers<[1], [0], [0], [1], [0, 0, 1, 1], [], []>} : vector<8x32xbf16>, vector<32x128xbf16>, vector<8x128xf32> -> vector<8x128xf32>
    %145 = arith.addf %142, %144 : vector<8x128xf32>
    %146 = arith.negf %145 : vector<8x128xf32>
    %147 = math.exp %146 : vector<8x128xf32>
    %cst_26 = arith.constant 1.000000e+00 : f32
    %148 = vector.broadcast %cst_26 : f32 to vector<8x128xf32>
    %149 = arith.addf %148, %147 : vector<8x128xf32>
    %150 = arith.divf %148, %149 : vector<8x128xf32>
    %151 = math.tanh %145 : vector<8x128xf32>
    %152 = vector.extract_strided_slice %150 {offsets = [0, 32], sizes = [8, 32], strides = [1, 1]} : vector<8x128xf32> to vector<8x32xf32>
    %153 = arith.mulf %152, %138 : vector<8x32xf32>
    %154 = vector.extract_strided_slice %150 {offsets = [0, 0], sizes = [8, 32], strides = [1, 1]} : vector<8x128xf32> to vector<8x32xf32>
    %155 = vector.extract_strided_slice %151 {offsets = [0, 64], sizes = [8, 32], strides = [1, 1]} : vector<8x128xf32> to vector<8x32xf32>
    %156 = arith.mulf %154, %155 : vector<8x32xf32>
    %157 = arith.addf %153, %156 : vector<8x32xf32>
    %158 = vector.extract_strided_slice %150 {offsets = [0, 96], sizes = [8, 32], strides = [1, 1]} : vector<8x128xf32> to vector<8x32xf32>
    %159 = math.tanh %157 : vector<8x32xf32>
    %160 = arith.mulf %158, %159 : vector<8x32xf32>
    %161 = tpu.concatenate %27, %46, %65, %84, %103, %122, %141, %160 in 0 : vector<8x32xf32>, vector<8x32xf32>, vector<8x32xf32>, vector<8x32xf32>, vector<8x32xf32>, vector<8x32xf32>, vector<8x32xf32>, vector<8x32xf32> -> vector<64x32xf32>
    %162 = arith.truncf %161 : vector<64x32xf32> to vector<64x32xbf16>
    %c0_27 = arith.constant 0 : index
    %c0_28 = arith.constant 0 : index
    %163 = vector.load %arg6[%c0_27, %c0_28] : memref<32x128xbf16, #tpu.memory_space<vmem>>, vector<32x128xbf16>
    %cst_29 = arith.constant dense<0.000000e+00> : vector<64x128xf32>
    %164 = tpu.matmul %162, %163, %cst_29 {dimension_numbers = #tpu.dot_dimension_numbers<[1], [0], [0], [1], [0, 0, 1, 1], [], []>} : vector<64x32xbf16>, vector<32x128xbf16>, vector<64x128xf32> -> vector<64x128xf32>
    %c0_30 = arith.constant 0 : index
    %c0_31 = arith.constant 0 : index
    %165 = vector.load %arg7[%c0_30, %c0_31] : memref<1x128xf32, #tpu.memory_space<vmem>>, vector<1x128xf32>
    %166 = vector.broadcast %165 : vector<1x128xf32> to vector<64x128xf32>
    %167 = arith.addf %164, %166 : vector<64x128xf32>
    %c0_32 = arith.constant 0 : index
    %c0_33 = arith.constant 0 : index
    %168 = vector.load %arg9[%c0_32, %c0_33] : memref<64x128xf32, #tpu.memory_space<vmem>>, vector<64x128xf32>
    tpu.vector_store %arg9[%c0_32, %c0_33], %167 {strides = array<i32>} : memref<64x128xf32, #tpu.memory_space<vmem>>, vector<64x128xf32>,
    %c0_34 = arith.constant 0 : index
    %c0_35 = arith.constant 0 : index
    %169 = vector.load %arg8[%c0_34, %c0_35] : memref<1x128xf32, #tpu.memory_space<vmem>>, vector<1x128xf32>
    %170 = vector.broadcast %169 : vector<1x128xf32> to vector<64x128xf32>
    %171 = arith.addf %167, %170 : vector<64x128xf32>
    %cst_36 = arith.constant dense<0xFF800000> : vector<64xf32>
    %172 = vector.multi_reduction <maximumf>, %171, %cst_36 [1] : vector<64x128xf32> to vector<64xf32>
    %173 = vector.shape_cast %172 : vector<64xf32> to vector<64x1xf32>
    %174 = vector.broadcast %173 : vector<64x1xf32> to vector<64x128xf32>
    %175 = arith.subf %171, %174 : vector<64x128xf32>
    %176 = math.exp %175 : vector<64x128xf32>
    %cst_37 = arith.constant dense<0.000000e+00> : vector<64xf32>
    %177 = vector.multi_reduction <add>, %176, %cst_37 [1] : vector<64x128xf32> to vector<64xf32>
    %178 = vector.shape_cast %177 : vector<64xf32> to vector<64x1xf32>
    %179 = tpu.reciprocal %178 : vector<64x1xf32> -> vector<64x1xf32>
    %180 = vector.broadcast %179 : vector<64x1xf32> to vector<64x128xf32>
    %181 = arith.mulf %176, %180 : vector<64x128xf32>
    %c0_38 = arith.constant 0 : index
    %c0_39 = arith.constant 0 : index
    %182 = vector.load %arg10[%c0_38, %c0_39] : memref<64x128xf32, #tpu.memory_space<vmem>>, vector<64x128xf32>
    tpu.vector_store %arg10[%c0_38, %c0_39], %181 {strides = array<i32>} : memref<64x128xf32, #tpu.memory_space<vmem>>, vector<64x128xf32>,
    %c0_40 = arith.constant 0 : index
    %c0_41 = arith.constant 0 : index
    %183 = vector.load %arg11[%c0_40, %c0_41] : memref<8x32xf32, #tpu.memory_space<vmem>>, vector<8x32xf32>
    tpu.vector_store %arg11[%c0_40, %c0_41], %160 {strides = array<i32>} : memref<8x32xf32, #tpu.memory_space<vmem>>, vector<8x32xf32>,
    %c0_42 = arith.constant 0 : index
    %c0_43 = arith.constant 0 : index
    %184 = vector.load %arg12[%c0_42, %c0_43] : memref<8x32xf32, #tpu.memory_space<vmem>>, vector<8x32xf32>
    tpu.vector_store %arg12[%c0_42, %c0_43], %157 {strides = array<i32>} : memref<8x32xf32, #tpu.memory_space<vmem>>, vector<8x32xf32>,
    return
  }
}

</mosaic_0001>

<bundles_post_ra>
// kernel: sup_sep_forward.2
= control target key start
LH: loop header
LB: loop body
LE: loop exit
PB: predicated region body
PF: predicated region fallthrough
CT: control target
= control target key end

     0   :  { %vm99_vm0 = vcmask 1043456   ;;  %vm100_vm1 = vcmask 1044480   ;;  %vm86_vm2 = vcmask 203776   ;;  %v1157_v1 = vmov 65535   ;;  %s1161_s14 = smov 32   ;;  %s1445_s3 = inlined_call_operand.vmem [shape: bf16[25,128], index: 3, kind: input, shape index: {}]   ;;  %s1446_s8 = inlined_call_operand.vmem [shape: f32[1,128], index: 8, kind: input, shape index: {}]   ;;  %s1447_s0 = inlined_call_operand.vmem [shape: bf16[64,25], index: 0, kind: input, shape index: {}]   ;;  %s1448_s4 = inlined_call_operand.vmem [shape: bf16[32,128], index: 4, kind: input, shape index: {}]   ;;  %s1449_s1 = inlined_call_operand.vmem [shape: f32[8,32], index: 1, kind: input, shape index: {}, may-alias: {1,2}]   ;;  %s1450_s5 = inlined_call_operand.vmem [shape: f32[1,128], index: 5, kind: input, shape index: {}]   ;;  %s1451_s2 = inlined_call_operand.vmem [shape: f32[8,32], index: 2, kind: input, shape index: {}, may-alias: {1,2}]   ;;  %s1452_s6 = inlined_call_operand.vmem [shape: bf16[32,128], index: 6, kind: input, shape index: {}]   ;;  %s1453_s10 = inlined_call_operand.vmem [shape: f32[8,32], index: 10, kind: output, shape index: {1}]   ;;  %s1454_s11 = inlined_call_operand.vmem [shape: f32[8,32], index: 11, kind: output, shape index: {2}]   ;;  %s1455_s7 = inlined_call_operand.vmem [shape: f32[1,128], index: 7, kind: input, shape index: {}]   ;;  %s1456_s9 = inlined_call_operand.vmem [shape: f32[64,128], index: 9, kind: output, shape index: {0}]  }
   0x1   :  { %v1083_v0 = vld [vmem:[%s1445_s3] sm:$0xff]   ;;  %v101_v2 = vsel %vm99_vm0, 4294967295, %v1157_v1  ;;  %v1084_v3 = vld [vmem:[%s1445_s3 + $0x8] sm:$0x1f]   ;;  %v1085_v5 = vld [vmem:[%s1447_s0 + $0x10] sm:$0xff]   ;;  %v1158_v11 = vmov 0.0  }
   0x2   :  { %1073 = vmatprep.subr.bf16.mxu1 %v1083_v0  ;;  %985 = vmatprep.subr.bf16.mxu0 %v1083_v0  ;;  %v102_v4 = vsel %vm100_vm1, %v101_v2, 0  ;;  %v1086_v7 = vld [vmem:[%s1447_s0 + $0x18] sm:$0xff]   ;;  %v1088_v8 = vld [vmem:[%s1447_s0] sm:$0xff]   ;;  %v1089_v9 = vld [vmem:[%s1447_s0 + $0x8] sm:$0xff]   ;;  %vm1159_vm3 = vmmov 0   ;;  %vm190_vm4 = vcmask 261120  }
   0x3   :  { %1075 = vmatpush3.bf16.msra.mxu1 %v1083_v0  ;;  %986 = vmatpush3.bf16.msra.mxu0 %v1083_v0  ;;  %v104_v6 = vand.u32 %v1084_v3, %v102_v4  ;;  %v1245_v10 = vld [vmem:[%s1448_s4] sm:$0xff]   ;;  %v1256_v12 = vld [vmem:[%s1448_s4 + $0x8] sm:$0xff]  }
   0x4   :  { %993 = vmatprep.mubr.msk.bf16.mxu1 %vm86_vm2, %v1085_v5  ;;  %989 = vmatprep.mubr.msk.bf16.mxu0 %vm86_vm2, %v1088_v8  ;;  %v175_v13 = vld [vmem:[%s1449_s1] sm:$0xff] }
   0x5   :  { %1074 = vmatprep.subr.bf16.mxu1 %v104_v6  ;;  %987 = vmatprep.subr.bf16.mxu0 %v104_v6  ;;  %v177_v14 = vpack.c.bf16 %v175_v13, %v175_v13  ;;  %v913_v15 = vld [vmem:[%s1450_s5] ss:$0 sm:$0xff]  ;;  %s1160_s5 = smov 64  }
   0x6   :  { %v176_v38 = vld [vmem:[%s1451_s2] sm:$0xff] }
   0x7   :  { %1076 = vmatpush3.bf16.msra.mxu1 %v104_v6  ;;  %988 = vmatpush3.bf16.msra.mxu0 %v104_v6 }
   0x8   :  { %997 = vmatprep.subr.bf16.mxu1 %v1158_v11  ;;  %1013 = vmatprep.subr.bf16.mxu0 %v1158_v11 }
   0xa   :  { %994 = vmatmul.mubr.msk.bf16.vlgmr.msra.gmra.mrb[0].mxu1 %vm86_vm2, %v1086_v7  ;;  %990 = vmatmul.mubr.msk.bf16.vlgmr.msra.gmra.mrb[0].mxu0 %vm86_vm2, %v1089_v9 }
   0xb   :  { %998 = vmatpush3.bf16.msra.mxu1 %v1245_v10  ;;  %1001 = vmatprep.mubr.msk.bf16.mxu1 %vm1159_vm3, %v1158_v11 }
   0xc   :  { %999 = vmatprep.subr.bf16.mxu1 %v1158_v11  ;;  %1014 = vmatpush3.bf16.msra.mxu0 %v1245_v10 }
   0xd   :  { %1015 = vmatprep.subr.bf16.mxu0 %v1158_v11  ;;  %1017 = vmatprep.mubr.msk.bf16.mxu0 %vm1159_vm3, %v1158_v11 }
   0xf   :  { %1000 = vmatpush3.bf16.msra.mxu1 %v1256_v12 }
  0x10   :  { %1005 = vmatprep.subr.bf16.mxu1 %v1158_v11  ;;  %1016 = vmatpush3.bf16.msra.mxu0 %v1256_v12 }
  0x11   :  { %1029 = vmatprep.subr.bf16.mxu0 %v1158_v11 }
  0x12   :  { %1002 = vmatmul.mubr.msk.bf16.vlgmr.msra.gmra.mrb[4].mxu1 %vm190_vm4, %v177_v14 }
  0x13   :  { %1006 = vmatpush3.bf16.msra.mxu1 %v1245_v10  ;;  %1009 = vmatprep.mubr.msk.bf16.mxu1 %vm1159_vm3, %v1158_v11 }
  0x14   :  { %1007 = vmatprep.subr.bf16.mxu1 %v1158_v11 }
  0x17   :  { %1008 = vmatpush3.bf16.msra.mxu1 %v1256_v12 }
  0x18   :  { %1021 = vmatprep.subr.bf16.mxu1 %v1158_v11 }
  0xdd   :  { %v995_v16 = vpop.f32.mrb[0].mxu1  ;;  %v991_v17 = vpop.f32.mrb[0].mxu0 }
  0xde   :  { %v1282_v18 = vadd.f32 %v995_v16, %v913_v15  ;;  %v156_v19 = vpop.f32.mrb[1].mxu1  ;;  %v1284_v20 = vadd.f32 %v991_v17, %v913_v15  ;;  %v140_v21 = vpop.f32.mrb[1].mxu0 }
  0xdf   :  { %v1286_v22 = vadd.f32 %v913_v15, %v156_v19  ;;  %v996_v23 = vpop.f32.mrb[2].mxu1  ;;  %v992_v24 = vpop.f32.mrb[2].mxu0  ;;  %v141_v31 = vadd.f32 %v913_v15, %v140_v21 }
  0xe0   :  { %v1288_v25 = vadd.f32 %v996_v23, %v913_v15  ;;  %v159_v26 = vpop.f32.mrb[3].mxu1  ;;  %v1290_v27 = vadd.f32 %v992_v24, %v913_v15  ;;  %v143_v28 = vpop.f32.mrb[3].mxu0 }
  0xe1   :  { %v1292_v29 = vadd.f32 %v913_v15, %v159_v26  ;;  %v144_v30 = vadd.f32 %v913_v15, %v143_v28 }
  0xe5   :  { %v228_v32 = vpop.f32.mrb[4].mxu1 }
  0xe6   :  { %v234_v33 = vadd.f32 %v228_v32, %v141_v31  ;;  %v1003_v34 = vpop.f32.mrb[5].mxu1 }
  0xe7   :  { %v231_v35 = vpop.f32.mrb[6].mxu1 }
  0xe8   :  { %1093 = vtanh.f32 %v234_v33  ;;  %v1004_v36 = vpop.f32.mrb[7].mxu1  ;;  %v927_v39 = vmul.f32 -1.442695, %v234_v33 }
  0xea   :  { %1095 = vpow2.f32 %v927_v39 }
  0xf2   :  { %v1094_v37 = vpop.eup %1093 }
  0xf3   :  { %248 = vrot.lane.b32.xlu0 %v1094_v37, %s1160_s5 }
  0xf4   :  { %v1096_v40 = vpop.eup %1095 }
  0xf5   :  { %v238_v41 = vadd.f32 1.0, %v1096_v40 }
  0xf7   :  { %243 = vrot.lane.b32.xlu0 %v176_v38, %s1161_s14  ;;  %1097 = vrcp.f32 %v238_v41 }
 0x101   :  { %v1098_v42 = vpop.eup %1097 }
 0x165   :  { %v249_v43 = vpop.permute.xlu0 %248 }
 0x166   :  { %v251_v44 = vmul.f32 %v1098_v42, %v249_v43 }
 0x168   :  { %253 = vrot.lane.b32.xlu1 %v251_v44, %s1161_s14 }
 0x169   :  { %v244_v45 = vpop.permute.xlu0 %243 }
 0x16a   :  { %v246_v46 = vmul.f32 %v1098_v42, %v244_v45 }
 0x1da   :  { %v254_v47 = vpop.permute.xlu1 %253 }
 0x1db   :  { %v256_v48 = vadd.f32 %v254_v47, %v246_v46 }
 0x1dd   :  { %1099 = vtanh.f32 %v256_v48 }
 0x1e7   :  { %v1100_v49 = vpop.eup %1099 }
 0x1e8   :  { %259 = vrot.lane.b32.xlu1 %v1100_v49, %s1160_s5 }
 0x25a   :  { %v260_v50 = vpop.permute.xlu1 %259 }
 0x25b   :  { %v1301_v51 = vmul.f32 %v1098_v42, %v260_v50 }
 0x25d   :  { %v263_v52 = vpack.c.bf16 %v1301_v51, %v1301_v51 }
 0x25f   :  { %265 = vrot.lane.b32.xlu0 %v263_v52, %s1161_s14 }
 0x2d1   :  { %v266_v53 = vpop.permute.xlu0 %265 }
 0x2d2   :  { %1010 = vmatmul.mubr.msk.bf16.vlgmr.msra.gmra.mrb[8].mxu1 %vm190_vm4, %v266_v53 }
 0x2d3   :  { %1022 = vmatpush3.bf16.msra.mxu1 %v1245_v10  ;;  %1025 = vmatprep.mubr.msk.bf16.mxu1 %vm1159_vm3, %v1158_v11 }
 0x2d4   :  { %1023 = vmatprep.subr.bf16.mxu1 %v1158_v11 }
 0x2d7   :  { %1024 = vmatpush3.bf16.msra.mxu1 %v1256_v12 }
 0x2d8   :  { %1037 = vmatprep.subr.bf16.mxu1 %v1158_v11 }
 0x3a5   :  { %v304_v54 = vpop.f32.mrb[8].mxu1 }
 0x3a6   :  { %v310_v55 = vadd.f32 %v304_v54, %v144_v30  ;;  %v1011_v56 = vpop.f32.mrb[9].mxu1 }
 0x3a7   :  { %v307_v57 = vpop.f32.mrb[10].mxu1 }
 0x3a8   :  { %1101 = vtanh.f32 %v310_v55  ;;  %v1012_v58 = vpop.f32.mrb[11].mxu1  ;;  %v929_v60 = vmul.f32 -1.442695, %v310_v55 }
 0x3aa   :  { %1103 = vpow2.f32 %v929_v60 }
 0x3b2   :  { %v1102_v59 = vpop.eup %1101 }
 0x3b3   :  { %320 = vrot.lane.b32.xlu1 %v1102_v59, %s1160_s5 }
 0x3b4   :  { %v1104_v61 = vpop.eup %1103 }
 0x3b5   :  { %v314_v62 = vadd.f32 1.0, %v1104_v61 }
 0x3b7   :  { %1105 = vrcp.f32 %v314_v62 }
 0x3c1   :  { %v1106_v63 = vpop.eup %1105 }
 0x3c2   :  { %v318_v2 = vmul.f32 %v1106_v63, %v256_v48 }
 0x425   :  { %v321_v0 = vpop.permute.xlu1 %320 }
 0x426   :  { %v323_v1 = vmul.f32 %v1106_v63, %v321_v0 }
 0x428   :  { %325 = vrot.lane.b32.xlu0 %v323_v1, %s1161_s14 }
 0x49a   :  { %v326_v3 = vpop.permute.xlu0 %325 }
 0x49b   :  { %v328_v4 = vadd.f32 %v326_v3, %v318_v2 }
 0x49d   :  { %1107 = vtanh.f32 %v328_v4 }
 0x4a7   :  { %v1108_v5 = vpop.eup %1107 }
 0x4a8   :  { %331 = vrot.lane.b32.xlu1 %v1108_v5, %s1160_s5 }
 0x51a   :  { %v332_v6 = vpop.permute.xlu1 %331 }
 0x51b   :  { %v1316_v7 = vmul.f32 %v1106_v63, %v332_v6 }
 0x51d   :  { %v335_v8 = vpack.c.bf16 %v1316_v7, %v1316_v7 }
 0x51f   :  { %337 = vrot.lane.b32.xlu0 %v335_v8, %s1161_s14 }
 0x591   :  { %v338_v9 = vpop.permute.xlu0 %337 }
 0x592   :  { %1018 = vmatmul.mubr.msk.bf16.vlgmr.msra.gmra.mrb[4].mxu0 %vm190_vm4, %v338_v9 }
 0x593   :  { %1030 = vmatpush3.bf16.msra.mxu0 %v1245_v10  ;;  %1033 = vmatprep.mubr.msk.bf16.mxu0 %vm1159_vm3, %v1158_v11 }
 0x594   :  { %1031 = vmatprep.subr.bf16.mxu0 %v1158_v11 }
 0x597   :  { %1032 = vmatpush3.bf16.msra.mxu0 %v1256_v12 }
 0x598   :  { %1045 = vmatprep.subr.bf16.mxu0 %v1158_v11 }
 0x665   :  { %v376_v13 = vpop.f32.mrb[4].mxu0 }
 0x666   :  { %v382_v14 = vadd.f32 %v376_v13, %v1284_v20  ;;  %v1019_v15 = vpop.f32.mrb[5].mxu0 }
 0x667   :  { %v379_v16 = vpop.f32.mrb[6].mxu0 }
 0x668   :  { %1109 = vtanh.f32 %v382_v14  ;;  %v1020_v17 = vpop.f32.mrb[7].mxu0  ;;  %v931_v21 = vmul.f32 -1.442695, %v382_v14 }
 0x66a   :  { %1111 = vpow2.f32 %v931_v21 }
 0x672   :  { %v1110_v19 = vpop.eup %1109 }
 0x673   :  { %392 = vrot.lane.b32.xlu1 %v1110_v19, %s1160_s5 }
 0x674   :  { %v1112_v23 = vpop.eup %1111 }
 0x675   :  { %v386_v24 = vadd.f32 1.0, %v1112_v23 }
 0x677   :  { %1113 = vrcp.f32 %v386_v24 }
 0x681   :  { %v1114_v26 = vpop.eup %1113 }
 0x682   :  { %v390_v31 = vmul.f32 %v1114_v26, %v328_v4 }
 0x6e5   :  { %v393_v28 = vpop.permute.xlu1 %392 }
 0x6e6   :  { %v395_v30 = vmul.f32 %v1114_v26, %v393_v28 }
 0x6e8   :  { %397 = vrot.lane.b32.xlu0 %v395_v30, %s1161_s14 }
 0x75a   :  { %v398_v32 = vpop.permute.xlu0 %397 }
 0x75b   :  { %v400_v20 = vadd.f32 %v398_v32, %v390_v31 }
 0x75d   :  { %1115 = vtanh.f32 %v400_v20 }
 0x767   :  { %v1116_v33 = vpop.eup %1115 }
 0x768   :  { %403 = vrot.lane.b32.xlu1 %v1116_v33, %s1160_s5 }
 0x7da   :  { %v404_v34 = vpop.permute.xlu1 %403 }
 0x7db   :  { %v1332_v35 = vmul.f32 %v1114_v26, %v404_v34 }
 0x7dd   :  { %v407_v36 = vpack.c.bf16 %v1332_v35, %v1332_v35 }
 0x7df   :  { %409 = vrot.lane.b32.xlu0 %v407_v36, %s1161_s14 }
 0x851   :  { %v410_v37 = vpop.permute.xlu0 %409 }
 0x852   :  { %1026 = vmatmul.mubr.msk.bf16.vlgmr.msra.gmra.mrb[12].mxu1 %vm190_vm4, %v410_v37 }
 0x853   :  { %1038 = vmatpush3.bf16.msra.mxu1 %v1245_v10  ;;  %1041 = vmatprep.mubr.msk.bf16.mxu1 %vm1159_vm3, %v1158_v11 }
 0x854   :  { %1039 = vmatprep.subr.bf16.mxu1 %v1158_v11 }
 0x857   :  { %1040 = vmatpush3.bf16.msra.mxu1 %v1256_v12 }
 0x858   :  { %1053 = vmatprep.subr.bf16.mxu1 %v1158_v11 }
 0x925   :  { %v448_v38 = vpop.f32.mrb[12].mxu1 }
 0x926   :  { %v454_v39 = vadd.f32 %v448_v38, %v1290_v27  ;;  %v1027_v40 = vpop.f32.mrb[13].mxu1 }
 0x927   :  { %v451_v41 = vpop.f32.mrb[14].mxu1 }
 0x928   :  { %1117 = vtanh.f32 %v454_v39  ;;  %v1028_v42 = vpop.f32.mrb[15].mxu1  ;;  %v933_v44 = vmul.f32 -1.442695, %v454_v39 }
 0x92a   :  { %1119 = vpow2.f32 %v933_v44 }
 0x932   :  { %v1118_v43 = vpop.eup %1117 }
 0x933   :  { %464 = vrot.lane.b32.xlu1 %v1118_v43, %s1160_s5 }
 0x934   :  { %v1120_v45 = vpop.eup %1119 }
 0x935   :  { %v458_v46 = vadd.f32 1.0, %v1120_v45 }
 0x937   :  { %1121 = vrcp.f32 %v458_v46 }
 0x941   :  { %v1122_v47 = vpop.eup %1121 }
 0x942   :  { %v462_v50 = vmul.f32 %v1122_v47, %v400_v20 }
 0x9a5   :  { %v465_v48 = vpop.permute.xlu1 %464 }
 0x9a6   :  { %v467_v49 = vmul.f32 %v1122_v47, %v465_v48 }
 0x9a8   :  { %469 = vrot.lane.b32.xlu0 %v467_v49, %s1161_s14 }
 0xa1a   :  { %v470_v52 = vpop.permute.xlu0 %469 }
 0xa1b   :  { %v472_v27 = vadd.f32 %v470_v52, %v462_v50 }
 0xa1d   :  { %1123 = vtanh.f32 %v472_v27 }
 0xa27   :  { %v1124_v53 = vpop.eup %1123 }
 0xa28   :  { %475 = vrot.lane.b32.xlu1 %v1124_v53, %s1160_s5 }
 0xa9a   :  { %v476_v54 = vpop.permute.xlu1 %475 }
 0xa9b   :  { %v1348_v55 = vmul.f32 %v1122_v47, %v476_v54 }
 0xa9d   :  { %v479_v56 = vpack.c.bf16 %v1348_v55, %v1348_v55 }
 0xa9f   :  { %481 = vrot.lane.b32.xlu0 %v479_v56, %s1161_s14 }
 0xb11   :  { %v482_v57 = vpop.permute.xlu0 %481 }
 0xb12   :  { %1034 = vmatmul.mubr.msk.bf16.vlgmr.msra.gmra.mrb[8].mxu0 %vm190_vm4, %v482_v57 }
 0xb13   :  { %1046 = vmatpush3.bf16.msra.mxu0 %v1245_v10  ;;  %1049 = vmatprep.mubr.msk.bf16.mxu0 %vm1159_vm3, %v1158_v11 }
 0xb14   :  { %1047 = vmatprep.subr.bf16.mxu0 %v1158_v11 }
 0xb17   :  { %1048 = vmatpush3.bf16.msra.mxu0 %v1256_v12 }
 0xbe5   :  { %v520_v58 = vpop.f32.mrb[8].mxu0 }
 0xbe6   :  { %v526_v59 = vadd.f32 %v520_v58, %v1286_v22  ;;  %v1035_v60 = vpop.f32.mrb[9].mxu0 }
 0xbe7   :  { %v523_v61 = vpop.f32.mrb[10].mxu0 }
 0xbe8   :  { %1125 = vtanh.f32 %v526_v59  ;;  %v1036_v62 = vpop.f32.mrb[11].mxu0  ;;  %v935_v0 = vmul.f32 -1.442695, %v526_v59 }
 0xbea   :  { %1127 = vpow2.f32 %v935_v0 }
 0xbf2   :  { %v1126_v63 = vpop.eup %1125 }
 0xbf3   :  { %536 = vrot.lane.b32.xlu1 %v1126_v63, %s1160_s5 }
 0xbf4   :  { %v1128_v1 = vpop.eup %1127 }
 0xbf5   :  { %v530_v2 = vadd.f32 1.0, %v1128_v1 }
 0xbf7   :  { %1129 = vrcp.f32 %v530_v2 }
 0xc01   :  { %v1130_v3 = vpop.eup %1129 }
 0xc02   :  { %v534_v6 = vmul.f32 %v1130_v3, %v472_v27 }
 0xc65   :  { %v537_v4 = vpop.permute.xlu1 %536 }
 0xc66   :  { %v539_v5 = vmul.f32 %v1130_v3, %v537_v4 }
 0xc68   :  { %541 = vrot.lane.b32.xlu0 %v539_v5, %s1161_s14 }
 0xcda   :  { %v542_v8 = vpop.permute.xlu0 %541 }
 0xcdb   :  { %v544_v22 = vadd.f32 %v542_v8, %v534_v6  ;;  %v1091_v8 = vld [vmem:[%s1452_s6] sm:$0xff]  }
 0xcdc   :  { %1061 = vmatprep.subr.bf16.mxu0 %v1091_v8 }
 0xcdd   :  { %1131 = vtanh.f32 %v544_v22 }
 0xce7   :  { %v1132_v9 = vpop.eup %1131 }
 0xce8   :  { %547 = vrot.lane.b32.xlu1 %v1132_v9, %s1160_s5 }
 0xd5a   :  { %v548_v13 = vpop.permute.xlu1 %547 }
 0xd5b   :  { %v1363_v14 = vmul.f32 %v1130_v3, %v548_v13  ;;  %v1092_v13 = vld [vmem:[%s1452_s6 + $0x8] sm:$0xff]   ;;  %s1162_s6 = smov 96  }
 0xd5d   :  { %v551_v15 = vpack.c.bf16 %v1363_v14, %v1363_v14 }
 0xd5f   :  { %553 = vrot.lane.b32.xlu0 %v551_v15, %s1161_s14 }
 0xdd1   :  { %v554_v16 = vpop.permute.xlu0 %553 }
 0xdd2   :  { %1042 = vmatmul.mubr.msk.bf16.vlgmr.msra.gmra.mrb[16].mxu1 %vm190_vm4, %v554_v16 }
 0xdd3   :  { %1054 = vmatpush3.bf16.msra.mxu1 %v1245_v10  ;;  %1057 = vmatprep.mubr.msk.bf16.mxu1 %vm1159_vm3, %v1158_v11 }
 0xdd4   :  { %1055 = vmatprep.subr.bf16.mxu1 %v1158_v11 }
 0xdd7   :  { %1056 = vmatpush3.bf16.msra.mxu1 %v1256_v12 }
 0xea5   :  { %v592_v17 = vpop.f32.mrb[16].mxu1 }
 0xea6   :  { %v598_v19 = vadd.f32 %v592_v17, %v1292_v29  ;;  %v1043_v21 = vpop.f32.mrb[17].mxu1 }
 0xea7   :  { %v595_v23 = vpop.f32.mrb[18].mxu1 }
 0xea8   :  { %1133 = vtanh.f32 %v598_v19  ;;  %v1044_v24 = vpop.f32.mrb[19].mxu1  ;;  %v937_v28 = vmul.f32 -1.442695, %v598_v19 }
 0xeaa   :  { %1135 = vpow2.f32 %v937_v28  ;;  %v942_v28 = vld [vmem:[%s1455_s7] ss:$0 sm:$0xff] }
 0xeb2   :  { %v1134_v26 = vpop.eup %1133 }
 0xeb3   :  { %608 = vrot.lane.b32.xlu1 %v1134_v26, %s1160_s5 }
 0xeb4   :  { %v1136_v10 = vpop.eup %1135 }
 0xeb5   :  { %v602_v30 = vadd.f32 1.0, %v1136_v10 }
 0xeb7   :  { %1137 = vrcp.f32 %v602_v30 }
 0xec1   :  { %v1138_v31 = vpop.eup %1137 }
 0xec2   :  { %v606_v12 = vmul.f32 %v1138_v31, %v544_v22 }
 0xf25   :  { %v609_v32 = vpop.permute.xlu1 %608 }
 0xf26   :  { %v611_v11 = vmul.f32 %v1138_v31, %v609_v32 }
 0xf28   :  { %613 = vrot.lane.b32.xlu0 %v611_v11, %s1161_s14 }
 0xf9a   :  { %v614_v20 = vpop.permute.xlu0 %613 }
 0xf9b   :  { %v616_v29 = vadd.f32 %v614_v20, %v606_v12 }
 0xf9d   :  { %1139 = vtanh.f32 %v616_v29 }
 0xfa7   :  { %v1140_v33 = vpop.eup %1139 }
 0xfa8   :  { %619 = vrot.lane.b32.xlu1 %v1140_v33, %s1160_s5 }
0x101a   :  { %v620_v34 = vpop.permute.xlu1 %619 }
0x101b   :  { %v622_v36 = vmul.f32 %v1138_v31, %v620_v34 }
0x101d   :  { %v623_v37 = vpack.c.bf16 %v622_v36, %v622_v36  ;;  %v769_v22 = vpack.c.bf16 %v622_v36, %v1363_v14  ;;  %v768_v14 = vpack.c.bf16 %v1348_v55, %v1332_v35 }
0x101f   :  { %625 = vrot.lane.b32.xlu0 %v623_v37, %s1161_s14 }
0x1091   :  { %v626_v38 = vpop.permute.xlu0 %625 }
0x1092   :  { %1050 = vmatmul.mubr.msk.bf16.vlgmr.msra.gmra.mrb[12].mxu0 %vm190_vm4, %v626_v38 }
0x1093   :  { %1062 = vmatpush3.bf16.msra.mxu0 %v1091_v8 }
0x1094   :  { %1063 = vmatprep.subr.bf16.mxu0 %v1092_v13 }
0x1097   :  { %1064 = vmatpush3.bf16.msra.mxu0 %v1092_v13 }
0x1165   :  { %v664_v39 = vpop.f32.mrb[12].mxu0 }
0x1166   :  { %v670_v40 = vadd.f32 %v664_v39, %v1282_v18  ;;  %v1051_v41 = vpop.f32.mrb[13].mxu0 }
0x1167   :  { %v667_v42 = vpop.f32.mrb[14].mxu0 }
0x1168   :  { %1141 = vtanh.f32 %v670_v40  ;;  %v1052_v43 = vpop.f32.mrb[15].mxu0  ;;  %v939_v45 = vmul.f32 -1.442695, %v670_v40 }
0x116a   :  { %1143 = vpow2.f32 %v939_v45 }
0x1172   :  { %v1142_v44 = vpop.eup %1141 }
0x1173   :  { %680 = vrot.lane.b32.xlu1 %v1142_v44, %s1160_s5 }
0x1174   :  { %v1144_v46 = vpop.eup %1143 }
0x1175   :  { %v674_v47 = vadd.f32 1.0, %v1144_v46 }
0x1177   :  { %1145 = vrcp.f32 %v674_v47 }
0x1181   :  { %v1146_v48 = vpop.eup %1145 }
0x1182   :  { %v678_v52 = vmul.f32 %v1146_v48, %v616_v29 }
0x11e5   :  { %v681_v49 = vpop.permute.xlu1 %680 }
0x11e6   :  { %v683_v50 = vmul.f32 %v1146_v48, %v681_v49 }
0x11e8   :  { %685 = vrot.lane.b32.xlu0 %v683_v50, %s1161_s14 }
0x125a   :  { %v686_v27 = vpop.permute.xlu0 %685 }
0x125b   :  { %v688_v18 = vadd.f32 %v686_v27, %v678_v52 }
0x125d   :  { %1147 = vtanh.f32 %v688_v18 }
0x1267   :  { %v1148_v53 = vpop.eup %1147 }
0x1268   :  { %691 = vrot.lane.b32.xlu1 %v1148_v53, %s1160_s5 }
0x12da   :  { %v692_v54 = vpop.permute.xlu1 %691 }
0x12db   :  { %v694_v56 = vmul.f32 %v1146_v48, %v692_v54 }
0x12dd   :  { %v695_v57 = vpack.c.bf16 %v694_v56, %v694_v56 }
0x12df   :  { %697 = vrot.lane.b32.xlu0 %v695_v57, %s1161_s14 }
0x1351   :  { %v698_v58 = vpop.permute.xlu0 %697 }
0x1352   :  { %1058 = vmatmul.mubr.msk.bf16.vlgmr.msra.gmra.mrb[20].mxu1 %vm190_vm4, %v698_v58 }
0x1425   :  { %v736_v59 = vpop.f32.mrb[20].mxu1 }
0x1426   :  { %v742_v60 = vadd.f32 %v736_v59, %v1288_v25  ;;  %v1059_v61 = vpop.f32.mrb[21].mxu1  ;;  %v767_v25 = vpack.c.bf16 %v1316_v7, %v1301_v51 }
0x1427   :  { %v739_v62 = vpop.f32.mrb[22].mxu1 }
0x1428   :  { %1149 = vtanh.f32 %v742_v60  ;;  %v1060_v63 = vpop.f32.mrb[23].mxu1  ;;  %v941_v1 = vmul.f32 -1.442695, %v742_v60 }
0x142a   :  { %1151 = vpow2.f32 %v941_v1 }
0x1432   :  { %v1150_v0 = vpop.eup %1149 }
0x1433   :  { %752 = vrot.lane.b32.xlu1 %v1150_v0, %s1160_s5 }
0x1434   :  { %v1152_v2 = vpop.eup %1151 }
0x1435   :  { %v746_v3 = vadd.f32 1.0, %v1152_v2 }
0x1437   :  { %1153 = vrcp.f32 %v746_v3 }
0x1441   :  { %v1154_v4 = vpop.eup %1153 }
0x1442   :  { %v750_v9 = vmul.f32 %v1154_v4, %v688_v18 }
0x14a5   :  { %v753_v5 = vpop.permute.xlu1 %752 }
0x14a6   :  { %v755_v6 = vmul.f32 %v1154_v4, %v753_v5 }
0x14a8   :  { %757 = vrot.lane.b32.xlu0 %v755_v6, %s1161_s14 }
0x14ac   :  { %786 = vrot.lane.b32.xlu0 %v767_v25, %s1161_s14 }
0x14b0   :  { %790 = vrot.lane.b32.xlu0 %v769_v22, %s1161_s14 }
0x151a   :  { %v758_v15 = vpop.permute.xlu0 %757 }
0x151b   :  { %v760_v16 = vadd.f32 %v758_v15, %v750_v9 }
0x151d   :  { %1155 = vtanh.f32 %v760_v16 }
0x151e   :  { %v787_v51 = vpop.permute.xlu0 %786 }
0x151f   :  { %1065 = vmatprep.mubr.msk.bf16.mxu0 %vm190_vm4, %v787_v51 }
0x1522   :  { %v791_v24 = vpop.permute.xlu0 %790 }
0x1527   :  { %v1156_v7 = vpop.eup %1155 }
0x1528   :  { %763 = vrot.lane.b32.xlu1 %v1156_v7, %s1160_s5 }
0x152c   :  { %788 = vrot.lane.b32.xlu1 %v768_v14, %s1161_s14 }
0x159a   :  { %v764_v17 = vpop.permute.xlu1 %763 }
0x159b   :  { %v766_v19 = vmul.f32 %v1154_v4, %v764_v17 }
0x159d   :  { %v770_v21 = vpack.c.bf16 %v766_v19, %v694_v56  ;;  %892 = vrot.lane.b32.xlu0 %v766_v19, %s1161_s14 }
0x159e   :  { %v789_v23 = vpop.permute.xlu1 %788 }
0x159f   :  { %792 = vrot.lane.b32.xlu1 %v770_v21, %s1161_s14  ;;  %1066 = vmatmul.mubr.msk.bf16.vlgmr.msra.gmra.mrb[16].mxu0 %vm190_vm4, %v789_v23 }
0x15a0   :  { %1069 = vmatprep.mubr.msk.bf16.mxu0 %vm190_vm4, %v791_v24 }
0x15a3   :  { %897 = vrot.lane.b32.xlu1 %v760_v16, %s1162_s6 }
0x160f   :  { %v893_v26 = vpop.permute.xlu0 %892 }
0x1610   :  { %895 = vst.msk [vmem:[%s1453_s10] sm:$0xff] %vm190_vm4, %v893_v26 }
0x1611   :  { %v793_v35 = vpop.permute.xlu1 %792 }
0x1612   :  { %1070 = vmatmul.mubr.msk.bf16.gmra.mrb[20].mxu0 %vm190_vm4, %v793_v35 }
0x1615   :  { %v898_v55 = vpop.permute.xlu1 %897 }
0x1616   :  { %900 = vst.msk [vmem:[%s1454_s11] sm:$0xff] %vm190_vm4, %v898_v55 }
0x1672   :  { %v1067_v10 = vpop.f32.mrb[16].mxu0 }
0x1673   :  { %v861_v30 = vadd.f32 %v1067_v10, %v942_v28  ;;  %v852_v31 = vpop.f32.mrb[17].mxu0 }
0x1674   :  { %v853_v32 = vadd.f32 %v942_v28, %v852_v31  ;;  %v1068_v11 = vpop.f32.mrb[18].mxu0 }
0x1675   :  { %885 = vst [vmem:[%s1456_s9 + $0x10] sm:$0xff] %v861_v30  ;;  %v864_v12 = vadd.f32 %v1068_v11, %v942_v28  ;;  %v855_v20 = vpop.f32.mrb[19].mxu0 }
0x1676   :  { %883 = vst [vmem:[%s1456_s9] sm:$0xff] %v853_v32  ;;  %v856_v29 = vadd.f32 %v942_v28, %v855_v20 }
0x1677   :  { %886 = vst [vmem:[%s1456_s9 + $0x18] sm:$0xff] %v864_v12 }
0x1678   :  { %884 = vst [vmem:[%s1456_s9 + $0x8] sm:$0xff] %v856_v29 }
0x16e5   :  { %v1071_v33 = vpop.f32.mrb[20].mxu0 }
0x16e6   :  { %v877_v34 = vadd.f32 %v1071_v33, %v942_v28  ;;  %v868_v36 = vpop.f32.mrb[21].mxu0 }
0x16e7   :  { %v869_v37 = vadd.f32 %v942_v28, %v868_v36  ;;  %v1072_v38 = vpop.f32.mrb[22].mxu0 }
0x16e8   :  { %889 = vst [vmem:[%s1456_s9 + $0x30] sm:$0xff] %v877_v34  ;;  %v880_v39 = vadd.f32 %v1072_v38, %v942_v28  ;;  %v871_v40 = vpop.f32.mrb[23].mxu0 }
0x16e9   :  { %887 = vst [vmem:[%s1456_s9 + $0x20] sm:$0xff] %v869_v37  ;;  %v872_v41 = vadd.f32 %v942_v28, %v871_v40 }
0x16ea   :  { %890 = vst [vmem:[%s1456_s9 + $0x38] sm:$0xff] %v880_v39 }
0x16eb   :  { %888 = vst [vmem:[%s1456_s9 + $0x28] sm:$0xff] %v872_v41 }

// kernel: sup_sep_forward.3
= control target key start
LH: loop header
LB: loop body
LE: loop exit
PB: predicated region body
PF: predicated region fallthrough
CT: control target
= control target key end

     0   :  { %v1293_v1 = vmov 0.0   ;;  %vm1294_vm0 = vmmov 0   ;;  %vm92_vm1 = vcmask 326656   ;;  %vm105_vm2 = vcmask 1043456   ;;  %s1296_s23 = smov 32   ;;  %s1623_s3 = inlined_call_operand.vmem [shape: bf16[40,128], index: 3, kind: input, shape index: {}]   ;;  %s1624_s0 = inlined_call_operand.vmem [shape: bf16[64,40], index: 0, kind: input, shape index: {}]   ;;  %s1625_s4 = inlined_call_operand.vmem [shape: bf16[32,128], index: 4, kind: input, shape index: {}]   ;;  %s1626_s1 = inlined_call_operand.vmem [shape: f32[8,32], index: 1, kind: input, shape index: {}, may-alias: {1,2}]   ;;  %s1627_s5 = inlined_call_operand.vmem [shape: f32[1,128], index: 5, kind: input, shape index: {}]   ;;  %s1628_s2 = inlined_call_operand.vmem [shape: f32[8,32], index: 2, kind: input, shape index: {}, may-alias: {1,2}]   ;;  %s1629_s6 = inlined_call_operand.vmem [shape: bf16[32,128], index: 6, kind: input, shape index: {}]   ;;  %s1630_s7 = inlined_call_operand.vmem [shape: f32[1,128], index: 7, kind: input, shape index: {}]   ;;  %s1631_s8 = inlined_call_operand.vmem [shape: f32[1,128], index: 8, kind: input, shape index: {}]   ;;  %s1632_s9 = inlined_call_operand.vmem [shape: f32[64,128], index: 9, kind: output, shape index: {0}]   ;;  %s1633_s10 = inlined_call_operand.vmem [shape: f32[64,128], index: 10, kind: output, shape index: {1}]   ;;  %s1634_s11 = inlined_call_operand.vmem [shape: f32[8,32], index: 11, kind: output, shape index: {2}]   ;;  %s1635_s12 = inlined_call_operand.vmem [shape: f32[8,32], index: 12, kind: output, shape index: {3}]  }
   0x1   :  { %v1186_v0 = vld [vmem:[%s1623_s3] sm:$0xff]   ;;  %1112 = vmatprep.subr.bf16.mxu1 %v1293_v1  ;;  %1116 = vmatprep.mubr.msk.bf16.mxu1 %vm1294_vm0, %v1293_v1  ;;  %v1187_v2 = vld [vmem:[%s1623_s3 + $0x8] sm:$0xff]   ;;  %v1188_v4 = vld [vmem:[%s1623_s3 + $0x10] ss:$0 sps:$4 sm:$0xff]   ;;  %vm193_vm3 = vcmask 261120  }
   0x2   :  { %1090 = vmatprep.subr.bf16.mxu0 %v1186_v0  ;;  %v1189_v3 = vld [vmem:[%s1624_s0] sm:$0xff]   ;;  %v107_v6 = vsel %vm105_vm2, %v1188_v4, 0  ;;  %v1389_v7 = vld [vmem:[%s1625_s4 + $0x8] sm:$0xff]   ;;  %v1192_v9 = vld [vmem:[%s1624_s0 + $0x10] sm:$0xff]  }
   0x3   :  { %1091 = vmatpush3.bf16.msra.mxu0 %v1186_v0  ;;  %1096 = vmatprep.mubr.msk.bf16.mxu0 %vm92_vm1, %v1189_v3  ;;  %v1382_v5 = vld [vmem:[%s1625_s4] sm:$0xff]   ;;  %v1190_v8 = vld [vmem:[%s1624_s0 + $0x8] sm:$0xff]   ;;  %v1193_v10 = vld [vmem:[%s1624_s0 + $0x18] sm:$0xff]  }
   0x4   :  { %1092 = vmatprep.subr.bf16.mxu0 %v1187_v2  ;;  %1113 = vmatpush3.bf16.msra.mxu1 %v1382_v5  ;;  %v178_v11 = vld [vmem:[%s1626_s1] sm:$0xff]  ;;  %s1295_s1 = smov 64  }
   0x5   :  { %1114 = vmatprep.subr.bf16.mxu1 %v1293_v1  ;;  %v180_v12 = vpack.c.bf16 %v178_v11, %v178_v11  ;;  %v1015_v13 = vld [vmem:[%s1627_s5] ss:$0 sm:$0xff] }
   0x6   :  { %v179_v36 = vld [vmem:[%s1628_s2] sm:$0xff] }
   0x7   :  { %1093 = vmatpush3.bf16.msra.mxu0 %v1187_v2 }
   0x8   :  { %1180 = vmatprep.subr.msk.bf16.mxu0 %vm105_vm2, %v1188_v4  ;;  %1115 = vmatpush3.bf16.msra.mxu1 %v1389_v7 }
   0x9   :  { %1120 = vmatprep.subr.bf16.mxu1 %v1293_v1 }
   0xb   :  { %1095 = vmatpush3.bf16.msra.mxu0 %v107_v6 }
   0xc   :  { %1104 = vmatprep.subr.bf16.mxu0 %v1293_v1 }
   0xe   :  { %1097 = vmatmul.mubr.msk.bf16.vlgmr.msra.gmra.mrb[0].mxu0 %vm92_vm1, %v1190_v8 }
   0xf   :  { %1105 = vmatpush3.bf16.msra.mxu0 %v1382_v5  ;;  %1100 = vmatprep.mubr.msk.bf16.mxu0 %vm92_vm1, %v1192_v9 }
  0x10   :  { %1106 = vmatprep.subr.bf16.mxu0 %v1293_v1 }
  0x13   :  { %1107 = vmatpush3.bf16.msra.mxu0 %v1389_v7 }
  0x14   :  { %1128 = vmatprep.subr.bf16.mxu0 %v1293_v1 }
  0x16   :  { %1101 = vmatmul.mubr.msk.bf16.gmra.mrb[4].mxu0 %vm92_vm1, %v1193_v10 }
  0x17   :  { %1108 = vmatprep.mubr.msk.bf16.mxu0 %vm1294_vm0, %v1293_v1 }
  0x1e   :  { %1109 = vmatmul.mubr.msk.bf16.vlgmr.msra.gmra.mrb[8].mxu0 %vm193_vm3, %v180_v12 }
  0x1f   :  { %1129 = vmatpush3.bf16.msra.mxu0 %v1382_v5  ;;  %1132 = vmatprep.mubr.msk.bf16.mxu0 %vm1294_vm0, %v1293_v1 }
  0x20   :  { %1130 = vmatprep.subr.bf16.mxu0 %v1293_v1 }
  0x23   :  { %1131 = vmatpush3.bf16.msra.mxu0 %v1389_v7 }
  0x24   :  { %1144 = vmatprep.subr.bf16.mxu0 %v1293_v1 }
  0xe1   :  { %v1098_v14 = vpop.f32.mrb[0].mxu0 }
  0xe2   :  { %v1425_v15 = vadd.f32 %v1098_v14, %v1015_v13  ;;  %v143_v16 = vpop.f32.mrb[1].mxu0 }
  0xe3   :  { %v1099_v17 = vpop.f32.mrb[2].mxu0  ;;  %v144_v29 = vadd.f32 %v1015_v13, %v143_v16 }
  0xe4   :  { %v1427_v18 = vadd.f32 %v1099_v17, %v1015_v13  ;;  %v146_v19 = vpop.f32.mrb[3].mxu0 }
  0xe5   :  { %v147_v20 = vadd.f32 %v1015_v13, %v146_v19 }
  0xe9   :  { %v1102_v21 = vpop.f32.mrb[4].mxu0 }
  0xea   :  { %v1429_v22 = vadd.f32 %v1102_v21, %v1015_v13  ;;  %v159_v23 = vpop.f32.mrb[5].mxu0 }
  0xeb   :  { %v1431_v24 = vadd.f32 %v1015_v13, %v159_v23  ;;  %v1103_v25 = vpop.f32.mrb[6].mxu0 }
  0xec   :  { %v1433_v26 = vadd.f32 %v1103_v25, %v1015_v13  ;;  %v162_v27 = vpop.f32.mrb[7].mxu0 }
  0xed   :  { %v1435_v28 = vadd.f32 %v1015_v13, %v162_v27 }
  0xf1   :  { %v231_v30 = vpop.f32.mrb[8].mxu0 }
  0xf2   :  { %v237_v31 = vadd.f32 %v231_v30, %v144_v29  ;;  %v1110_v32 = vpop.f32.mrb[9].mxu0 }
  0xf3   :  { %v234_v33 = vpop.f32.mrb[10].mxu0 }
  0xf4   :  { %1197 = vtanh.f32 %v237_v31  ;;  %v1111_v34 = vpop.f32.mrb[11].mxu0  ;;  %v1030_v37 = vmul.f32 -1.442695, %v237_v31 }
  0xf6   :  { %1199 = vpow2.f32 %v1030_v37 }
  0xfe   :  { %v1198_v35 = vpop.eup %1197 }
  0xff   :  { %251 = vrot.lane.b32.xlu0 %v1198_v35, %s1295_s1 }
 0x100   :  { %v1200_v38 = vpop.eup %1199 }
 0x101   :  { %v241_v39 = vadd.f32 1.0, %v1200_v38 }
 0x103   :  { %246 = vrot.lane.b32.xlu0 %v179_v36, %s1296_s23  ;;  %1201 = vrcp.f32 %v241_v39 }
 0x10d   :  { %v1202_v40 = vpop.eup %1201 }
 0x171   :  { %v252_v41 = vpop.permute.xlu0 %251 }
 0x172   :  { %v254_v42 = vmul.f32 %v1202_v40, %v252_v41 }
 0x174   :  { %256 = vrot.lane.b32.xlu1 %v254_v42, %s1296_s23 }
 0x175   :  { %v247_v43 = vpop.permute.xlu0 %246 }
 0x176   :  { %v249_v44 = vmul.f32 %v1202_v40, %v247_v43 }
 0x1e6   :  { %v257_v45 = vpop.permute.xlu1 %256 }
 0x1e7   :  { %v259_v46 = vadd.f32 %v257_v45, %v249_v44 }
 0x1e9   :  { %1203 = vtanh.f32 %v259_v46 }
 0x1f3   :  { %v1204_v47 = vpop.eup %1203 }
 0x1f4   :  { %262 = vrot.lane.b32.xlu1 %v1204_v47, %s1295_s1 }
 0x266   :  { %v263_v48 = vpop.permute.xlu1 %262 }
 0x267   :  { %v1444_v49 = vmul.f32 %v1202_v40, %v263_v48 }
 0x269   :  { %v266_v50 = vpack.c.bf16 %v1444_v49, %v1444_v49 }
 0x26b   :  { %268 = vrot.lane.b32.xlu0 %v266_v50, %s1296_s23 }
 0x2dd   :  { %v269_v51 = vpop.permute.xlu0 %268 }
 0x2de   :  { %1117 = vmatmul.mubr.msk.bf16.vlgmr.msra.gmra.mrb[0].mxu1 %vm193_vm3, %v269_v51 }
 0x2df   :  { %1121 = vmatpush3.bf16.msra.mxu1 %v1382_v5  ;;  %1124 = vmatprep.mubr.msk.bf16.mxu1 %vm1294_vm0, %v1293_v1 }
 0x2e0   :  { %1122 = vmatprep.subr.bf16.mxu1 %v1293_v1 }
 0x2e3   :  { %1123 = vmatpush3.bf16.msra.mxu1 %v1389_v7 }
 0x2e4   :  { %1136 = vmatprep.subr.bf16.mxu1 %v1293_v1 }
 0x3b1   :  { %v307_v52 = vpop.f32.mrb[0].mxu1 }
 0x3b2   :  { %v313_v53 = vadd.f32 %v307_v52, %v147_v20  ;;  %v1118_v54 = vpop.f32.mrb[1].mxu1 }
 0x3b3   :  { %v310_v55 = vpop.f32.mrb[2].mxu1 }
 0x3b4   :  { %1205 = vtanh.f32 %v313_v53  ;;  %v1119_v56 = vpop.f32.mrb[3].mxu1  ;;  %v1032_v58 = vmul.f32 -1.442695, %v313_v53 }
 0x3b6   :  { %1207 = vpow2.f32 %v1032_v58 }
 0x3be   :  { %v1206_v57 = vpop.eup %1205 }
 0x3bf   :  { %323 = vrot.lane.b32.xlu1 %v1206_v57, %s1295_s1 }
 0x3c0   :  { %v1208_v59 = vpop.eup %1207 }
 0x3c1   :  { %v317_v60 = vadd.f32 1.0, %v1208_v59 }
 0x3c3   :  { %1209 = vrcp.f32 %v317_v60 }
 0x3cd   :  { %v1210_v61 = vpop.eup %1209 }
 0x3ce   :  { %v321_v0 = vmul.f32 %v1210_v61, %v259_v46 }
 0x431   :  { %v324_v62 = vpop.permute.xlu1 %323 }
 0x432   :  { %v326_v63 = vmul.f32 %v1210_v61, %v324_v62 }
 0x434   :  { %328 = vrot.lane.b32.xlu0 %v326_v63, %s1296_s23 }
 0x4a6   :  { %v329_v2 = vpop.permute.xlu0 %328 }
 0x4a7   :  { %v331_v3 = vadd.f32 %v329_v2, %v321_v0 }
 0x4a9   :  { %1211 = vtanh.f32 %v331_v3 }
 0x4b3   :  { %v1212_v4 = vpop.eup %1211 }
 0x4b4   :  { %334 = vrot.lane.b32.xlu1 %v1212_v4, %s1295_s1 }
 0x526   :  { %v335_v6 = vpop.permute.xlu1 %334 }
 0x527   :  { %v1459_v8 = vmul.f32 %v1210_v61, %v335_v6 }
 0x529   :  { %v338_v9 = vpack.c.bf16 %v1459_v8, %v1459_v8 }
 0x52b   :  { %340 = vrot.lane.b32.xlu0 %v338_v9, %s1296_s23 }
 0x59d   :  { %v341_v10 = vpop.permute.xlu0 %340 }
 0x59e   :  { %1125 = vmatmul.mubr.msk.bf16.vlgmr.msra.gmra.mrb[4].mxu1 %vm193_vm3, %v341_v10 }
 0x59f   :  { %1137 = vmatpush3.bf16.msra.mxu1 %v1382_v5  ;;  %1140 = vmatprep.mubr.msk.bf16.mxu1 %vm1294_vm0, %v1293_v1 }
 0x5a0   :  { %1138 = vmatprep.subr.bf16.mxu1 %v1293_v1 }
 0x5a3   :  { %1139 = vmatpush3.bf16.msra.mxu1 %v1389_v7 }
 0x5a4   :  { %1152 = vmatprep.subr.bf16.mxu1 %v1293_v1 }
 0x671   :  { %v379_v11 = vpop.f32.mrb[4].mxu1 }
 0x672   :  { %v385_v12 = vadd.f32 %v379_v11, %v1425_v15  ;;  %v1126_v13 = vpop.f32.mrb[5].mxu1 }
 0x673   :  { %v382_v14 = vpop.f32.mrb[6].mxu1 }
 0x674   :  { %1213 = vtanh.f32 %v385_v12  ;;  %v1127_v16 = vpop.f32.mrb[7].mxu1  ;;  %v1034_v19 = vmul.f32 -1.442695, %v385_v12 }
 0x676   :  { %1215 = vpow2.f32 %v1034_v19 }
 0x67e   :  { %v1214_v17 = vpop.eup %1213 }
 0x67f   :  { %395 = vrot.lane.b32.xlu1 %v1214_v17, %s1295_s1 }
 0x680   :  { %v1216_v20 = vpop.eup %1215 }
 0x681   :  { %v389_v21 = vadd.f32 1.0, %v1216_v20 }
 0x683   :  { %1217 = vrcp.f32 %v389_v21 }
 0x68d   :  { %v1218_v23 = vpop.eup %1217 }
 0x68e   :  { %v393_v29 = vmul.f32 %v1218_v23, %v331_v3 }
 0x6f1   :  { %v396_v25 = vpop.permute.xlu1 %395 }
 0x6f2   :  { %v398_v27 = vmul.f32 %v1218_v23, %v396_v25 }
 0x6f4   :  { %400 = vrot.lane.b32.xlu0 %v398_v27, %s1296_s23 }
 0x766   :  { %v401_v30 = vpop.permute.xlu0 %400 }
 0x767   :  { %v403_v15 = vadd.f32 %v401_v30, %v393_v29 }
 0x769   :  { %1219 = vtanh.f32 %v403_v15 }
 0x773   :  { %v1220_v31 = vpop.eup %1219 }
 0x774   :  { %406 = vrot.lane.b32.xlu1 %v1220_v31, %s1295_s1 }
 0x7e6   :  { %v407_v32 = vpop.permute.xlu1 %406 }
 0x7e7   :  { %v1475_v33 = vmul.f32 %v1218_v23, %v407_v32 }
 0x7e9   :  { %v410_v34 = vpack.c.bf16 %v1475_v33, %v1475_v33 }
 0x7eb   :  { %412 = vrot.lane.b32.xlu0 %v410_v34, %s1296_s23 }
 0x85d   :  { %v413_v35 = vpop.permute.xlu0 %412 }
 0x85e   :  { %1133 = vmatmul.mubr.msk.bf16.vlgmr.msra.gmra.mrb[12].mxu0 %vm193_vm3, %v413_v35 }
 0x85f   :  { %1145 = vmatpush3.bf16.msra.mxu0 %v1382_v5  ;;  %1148 = vmatprep.mubr.msk.bf16.mxu0 %vm1294_vm0, %v1293_v1 }
 0x860   :  { %1146 = vmatprep.subr.bf16.mxu0 %v1293_v1 }
 0x863   :  { %1147 = vmatpush3.bf16.msra.mxu0 %v1389_v7 }
 0x864   :  { %1160 = vmatprep.subr.bf16.mxu0 %v1293_v1 }
 0x931   :  { %v451_v36 = vpop.f32.mrb[12].mxu0 }
 0x932   :  { %v457_v37 = vadd.f32 %v451_v36, %v1427_v18  ;;  %v1134_v38 = vpop.f32.mrb[13].mxu0 }
 0x933   :  { %v454_v39 = vpop.f32.mrb[14].mxu0 }
 0x934   :  { %1221 = vtanh.f32 %v457_v37  ;;  %v1135_v40 = vpop.f32.mrb[15].mxu0  ;;  %v1036_v42 = vmul.f32 -1.442695, %v457_v37 }
 0x936   :  { %1223 = vpow2.f32 %v1036_v42 }
 0x93e   :  { %v1222_v41 = vpop.eup %1221 }
 0x93f   :  { %467 = vrot.lane.b32.xlu1 %v1222_v41, %s1295_s1 }
 0x940   :  { %v1224_v43 = vpop.eup %1223 }
 0x941   :  { %v461_v44 = vadd.f32 1.0, %v1224_v43 }
 0x943   :  { %1225 = vrcp.f32 %v461_v44 }
 0x94d   :  { %v1226_v45 = vpop.eup %1225 }
 0x94e   :  { %v465_v48 = vmul.f32 %v1226_v45, %v403_v15 }
 0x9b1   :  { %v468_v46 = vpop.permute.xlu1 %467 }
 0x9b2   :  { %v470_v47 = vmul.f32 %v1226_v45, %v468_v46 }
 0x9b4   :  { %472 = vrot.lane.b32.xlu0 %v470_v47, %s1296_s23 }
 0xa26   :  { %v473_v50 = vpop.permute.xlu0 %472 }
 0xa27   :  { %v475_v18 = vadd.f32 %v473_v50, %v465_v48 }
 0xa29   :  { %1227 = vtanh.f32 %v475_v18 }
 0xa33   :  { %v1228_v51 = vpop.eup %1227 }
 0xa34   :  { %478 = vrot.lane.b32.xlu1 %v1228_v51, %s1295_s1 }
 0xaa6   :  { %v479_v52 = vpop.permute.xlu1 %478 }
 0xaa7   :  { %v1491_v53 = vmul.f32 %v1226_v45, %v479_v52 }
 0xaa9   :  { %v482_v54 = vpack.c.bf16 %v1491_v53, %v1491_v53 }
 0xaab   :  { %484 = vrot.lane.b32.xlu0 %v482_v54, %s1296_s23 }
 0xb1d   :  { %v485_v55 = vpop.permute.xlu0 %484 }
 0xb1e   :  { %1141 = vmatmul.mubr.msk.bf16.vlgmr.msra.gmra.mrb[8].mxu1 %vm193_vm3, %v485_v55 }
 0xb1f   :  { %1153 = vmatpush3.bf16.msra.mxu1 %v1382_v5  ;;  %1156 = vmatprep.mubr.msk.bf16.mxu1 %vm1294_vm0, %v1293_v1 }
 0xb20   :  { %1154 = vmatprep.subr.bf16.mxu1 %v1293_v1 }
 0xb23   :  { %1155 = vmatpush3.bf16.msra.mxu1 %v1389_v7 }
 0xbf1   :  { %v523_v56 = vpop.f32.mrb[8].mxu1 }
 0xbf2   :  { %v529_v57 = vadd.f32 %v523_v56, %v1431_v24  ;;  %v1142_v58 = vpop.f32.mrb[9].mxu1 }
 0xbf3   :  { %v526_v59 = vpop.f32.mrb[10].mxu1 }
 0xbf4   :  { %1229 = vtanh.f32 %v529_v57  ;;  %v1143_v60 = vpop.f32.mrb[11].mxu1  ;;  %v1038_v62 = vmul.f32 -1.442695, %v529_v57 }
 0xbf6   :  { %1231 = vpow2.f32 %v1038_v62 }
 0xbfe   :  { %v1230_v61 = vpop.eup %1229 }
 0xbff   :  { %539 = vrot.lane.b32.xlu1 %v1230_v61, %s1295_s1 }
 0xc00   :  { %v1232_v63 = vpop.eup %1231 }
 0xc01   :  { %v533_v0 = vadd.f32 1.0, %v1232_v63 }
 0xc03   :  { %1233 = vrcp.f32 %v533_v0 }
 0xc0d   :  { %v1234_v2 = vpop.eup %1233 }
 0xc0e   :  { %v537_v6 = vmul.f32 %v1234_v2, %v475_v18 }
 0xc71   :  { %v540_v3 = vpop.permute.xlu1 %539 }
 0xc72   :  { %v542_v4 = vmul.f32 %v1234_v2, %v540_v3 }
 0xc74   :  { %544 = vrot.lane.b32.xlu0 %v542_v4, %s1296_s23 }
 0xce6   :  { %v545_v9 = vpop.permute.xlu0 %544 }
 0xce7   :  { %v547_v24 = vadd.f32 %v545_v9, %v537_v6  ;;  %v1195_v9 = vld [vmem:[%s1629_s6] sm:$0xff]  }
 0xce8   :  { %1168 = vmatprep.subr.bf16.mxu1 %v1195_v9 }
 0xce9   :  { %1235 = vtanh.f32 %v547_v24 }
 0xcf3   :  { %v1236_v10 = vpop.eup %1235 }
 0xcf4   :  { %550 = vrot.lane.b32.xlu1 %v1236_v10, %s1295_s1 }
 0xd66   :  { %v551_v11 = vpop.permute.xlu1 %550 }
 0xd67   :  { %v1506_v12 = vmul.f32 %v1234_v2, %v551_v11  ;;  %v1196_v11 = vld [vmem:[%s1629_s6 + $0x8] sm:$0xff]  }
 0xd69   :  { %v554_v13 = vpack.c.bf16 %v1506_v12, %v1506_v12 }
 0xd6b   :  { %556 = vrot.lane.b32.xlu0 %v554_v13, %s1296_s23 }
 0xddd   :  { %v557_v14 = vpop.permute.xlu0 %556 }
 0xdde   :  { %1149 = vmatmul.mubr.msk.bf16.vlgmr.msra.gmra.mrb[16].mxu0 %vm193_vm3, %v557_v14 }
 0xddf   :  { %1161 = vmatpush3.bf16.msra.mxu0 %v1382_v5  ;;  %1164 = vmatprep.mubr.msk.bf16.mxu0 %vm1294_vm0, %v1293_v1 }
 0xde0   :  { %1162 = vmatprep.subr.bf16.mxu0 %v1293_v1 }
 0xde3   :  { %1163 = vmatpush3.bf16.msra.mxu0 %v1389_v7 }
 0xeb1   :  { %v595_v16 = vpop.f32.mrb[16].mxu0 }
 0xeb2   :  { %v601_v17 = vadd.f32 %v595_v16, %v1435_v28  ;;  %v1150_v19 = vpop.f32.mrb[17].mxu0 }
 0xeb3   :  { %v598_v20 = vpop.f32.mrb[18].mxu0 }
 0xeb4   :  { %1237 = vtanh.f32 %v601_v17  ;;  %v1151_v21 = vpop.f32.mrb[19].mxu0  ;;  %v1040_v25 = vmul.f32 -1.442695, %v601_v17 }
 0xeb6   :  { %1239 = vpow2.f32 %v1040_v25 }
 0xebe   :  { %v1238_v23 = vpop.eup %1237 }
 0xebf   :  { %611 = vrot.lane.b32.xlu1 %v1238_v23, %s1295_s1 }
 0xec0   :  { %v1240_v5 = vpop.eup %1239 }
 0xec1   :  { %v605_v27 = vadd.f32 1.0, %v1240_v5 }
 0xec3   :  { %1241 = vrcp.f32 %v605_v27  ;;  %v1052_v27 = vld [vmem:[%s1631_s8] ss:$0 sm:$0xff] }
 0xecd   :  { %v1242_v29 = vpop.eup %1241 }
 0xece   :  { %v609_v7 = vmul.f32 %v1242_v29, %v547_v24 }
 0xf31   :  { %v612_v30 = vpop.permute.xlu1 %611 }
 0xf32   :  { %v614_v1 = vmul.f32 %v1242_v29, %v612_v30 }
 0xf34   :  { %616 = vrot.lane.b32.xlu0 %v614_v1, %s1296_s23 }
 0xfa6   :  { %v617_v15 = vpop.permute.xlu0 %616 }
 0xfa7   :  { %v619_v28 = vadd.f32 %v617_v15, %v609_v7 }
 0xfa9   :  { %1243 = vtanh.f32 %v619_v28 }
 0xfb3   :  { %v1244_v31 = vpop.eup %1243 }
 0xfb4   :  { %622 = vrot.lane.b32.xlu1 %v1244_v31, %s1295_s1 }
0x1026   :  { %v623_v32 = vpop.permute.xlu1 %622 }
0x1027   :  { %v625_v34 = vmul.f32 %v1242_v29, %v623_v32 }
0x1029   :  { %v626_v35 = vpack.c.bf16 %v625_v34, %v625_v34  ;;  %v772_v24 = vpack.c.bf16 %v625_v34, %v1506_v12  ;;  %v771_v12 = vpack.c.bf16 %v1491_v53, %v1475_v33  ;;  %v1045_v33 = vld [vmem:[%s1630_s7] ss:$0 sm:$0xff] }
0x102b   :  { %628 = vrot.lane.b32.xlu0 %v626_v35, %s1296_s23 }
0x109d   :  { %v629_v36 = vpop.permute.xlu0 %628 }
0x109e   :  { %1157 = vmatmul.mubr.msk.bf16.vlgmr.msra.gmra.mrb[12].mxu1 %vm193_vm3, %v629_v36 }
0x109f   :  { %1169 = vmatpush3.bf16.msra.mxu1 %v1195_v9 }
0x10a0   :  { %1170 = vmatprep.subr.bf16.mxu1 %v1196_v11 }
0x10a3   :  { %1171 = vmatpush3.bf16.msra.mxu1 %v1196_v11 }
0x1171   :  { %v667_v37 = vpop.f32.mrb[12].mxu1 }
0x1172   :  { %v673_v38 = vadd.f32 %v667_v37, %v1429_v22  ;;  %v1158_v39 = vpop.f32.mrb[13].mxu1 }
0x1173   :  { %v670_v40 = vpop.f32.mrb[14].mxu1 }
0x1174   :  { %1245 = vtanh.f32 %v673_v38  ;;  %v1159_v41 = vpop.f32.mrb[15].mxu1  ;;  %v1042_v43 = vmul.f32 -1.442695, %v673_v38 }
0x1176   :  { %1247 = vpow2.f32 %v1042_v43 }
0x117e   :  { %v1246_v42 = vpop.eup %1245 }
0x117f   :  { %683 = vrot.lane.b32.xlu1 %v1246_v42, %s1295_s1 }
0x1180   :  { %v1248_v44 = vpop.eup %1247 }
0x1181   :  { %v677_v45 = vadd.f32 1.0, %v1248_v44 }
0x1183   :  { %1249 = vrcp.f32 %v677_v45 }
0x118d   :  { %v1250_v46 = vpop.eup %1249 }
0x118e   :  { %v681_v50 = vmul.f32 %v1250_v46, %v619_v28 }
0x11f1   :  { %v684_v47 = vpop.permute.xlu1 %683 }
0x11f2   :  { %v686_v48 = vmul.f32 %v1250_v46, %v684_v47 }
0x11f4   :  { %688 = vrot.lane.b32.xlu0 %v686_v48, %s1296_s23 }
0x1266   :  { %v689_v18 = vpop.permute.xlu0 %688 }
0x1267   :  { %v691_v22 = vadd.f32 %v689_v18, %v681_v50 }
0x1269   :  { %1251 = vtanh.f32 %v691_v22 }
0x1273   :  { %v1252_v51 = vpop.eup %1251 }
0x1274   :  { %694 = vrot.lane.b32.xlu1 %v1252_v51, %s1295_s1 }
0x12e6   :  { %v695_v52 = vpop.permute.xlu1 %694 }
0x12e7   :  { %v697_v54 = vmul.f32 %v1250_v46, %v695_v52 }
0x12e9   :  { %v698_v55 = vpack.c.bf16 %v697_v54, %v697_v54 }
0x12eb   :  { %700 = vrot.lane.b32.xlu0 %v698_v55, %s1296_s23 }
0x135d   :  { %v701_v56 = vpop.permute.xlu0 %700 }
0x135e   :  { %1165 = vmatmul.mubr.msk.bf16.vlgmr.msra.gmra.mrb[20].mxu0 %vm193_vm3, %v701_v56 }
0x1431   :  { %v739_v57 = vpop.f32.mrb[20].mxu0 }
0x1432   :  { %v745_v58 = vadd.f32 %v739_v57, %v1433_v26  ;;  %v1166_v59 = vpop.f32.mrb[21].mxu0  ;;  %v770_v26 = vpack.c.bf16 %v1459_v8, %v1444_v49 }
0x1433   :  { %v742_v60 = vpop.f32.mrb[22].mxu0 }
0x1434   :  { %1253 = vtanh.f32 %v745_v58  ;;  %v1167_v61 = vpop.f32.mrb[23].mxu0  ;;  %v1044_v63 = vmul.f32 -1.442695, %v745_v58 }
0x1436   :  { %1255 = vpow2.f32 %v1044_v63 }
0x143e   :  { %v1254_v62 = vpop.eup %1253 }
0x143f   :  { %755 = vrot.lane.b32.xlu1 %v1254_v62, %s1295_s1 }
0x1440   :  { %v1256_v0 = vpop.eup %1255 }
0x1441   :  { %v749_v2 = vadd.f32 1.0, %v1256_v0 }
0x1443   :  { %1257 = vrcp.f32 %v749_v2 }
0x144d   :  { %v1258_v3 = vpop.eup %1257 }
0x144e   :  { %v753_v10 = vmul.f32 %v1258_v3, %v691_v22 }
0x14b1   :  { %v756_v4 = vpop.permute.xlu1 %755 }
0x14b2   :  { %v758_v6 = vmul.f32 %v1258_v3, %v756_v4 }
0x14b4   :  { %760 = vrot.lane.b32.xlu0 %v758_v6, %s1296_s23 }
0x14b8   :  { %789 = vrot.lane.b32.xlu0 %v770_v26, %s1296_s23 }
0x14bc   :  { %793 = vrot.lane.b32.xlu0 %v772_v24, %s1296_s23 }
0x1526   :  { %v761_v13 = vpop.permute.xlu0 %760 }
0x1527   :  { %v1543_v14 = vadd.f32 %v761_v13, %v753_v10 }
0x1529   :  { %1259 = vtanh.f32 %v1543_v14 }
0x152a   :  { %v790_v49 = vpop.permute.xlu0 %789 }
0x152b   :  { %1172 = vmatprep.mubr.msk.bf16.mxu1 %vm193_vm3, %v790_v49 }
0x152e   :  { %v794_v21 = vpop.permute.xlu0 %793 }
0x1533   :  { %v1260_v8 = vpop.eup %1259 }
0x1534   :  { %766 = vrot.lane.b32.xlu1 %v1260_v8, %s1295_s1 }
0x1538   :  { %791 = vrot.lane.b32.xlu1 %v771_v12, %s1296_s23 }
0x15a6   :  { %v767_v16 = vpop.permute.xlu1 %766 }
0x15a7   :  { %v1551_v17 = vmul.f32 %v1258_v3, %v767_v16 }
0x15a9   :  { %v773_v19 = vpack.c.bf16 %v1551_v17, %v697_v54 }
0x15aa   :  { %v792_v20 = vpop.permute.xlu1 %791 }
0x15ab   :  { %795 = vrot.lane.b32.xlu1 %v773_v19, %s1296_s23  ;;  %1173 = vmatmul.mubr.msk.bf16.vlgmr.msra.gmra.mrb[16].mxu1 %vm193_vm3, %v792_v20 }
0x15ac   :  { %1176 = vmatprep.mubr.msk.bf16.mxu1 %vm193_vm3, %v794_v21 }
0x161d   :  { %v796_v23 = vpop.permute.xlu1 %795 }
0x161e   :  { %1177 = vmatmul.mubr.msk.bf16.gmra.mrb[20].mxu1 %vm193_vm3, %v796_v23 }
0x167e   :  { %v1174_v53 = vpop.f32.mrb[16].mxu1 }
0x167f   :  { %v864_v25 = vadd.f32 %v1174_v53, %v1045_v33  ;;  %v855_v5 = vpop.f32.mrb[17].mxu1 }
0x1680   :  { %v856_v29 = vadd.f32 %v1045_v33, %v855_v5  ;;  %v1175_v30 = vpop.f32.mrb[18].mxu1 }
0x1681   :  { %888 = vst [vmem:[%s1632_s9 + $0x10] sm:$0xff] %v864_v25  ;;  %v867_v1 = vadd.f32 %v1175_v30, %v1045_v33  ;;  %v858_v7 = vpop.f32.mrb[19].mxu1  ;;  %v903_v32 = vadd.f32 %v1052_v27, %v864_v25 }
0x1682   :  { %886 = vst [vmem:[%s1632_s9] sm:$0xff] %v856_v29  ;;  %v859_v15 = vadd.f32 %v1045_v33, %v858_v7  ;;  %v901_v28 = vadd.f32 %v1052_v27, %v856_v29 }
0x1683   :  { %889 = vst [vmem:[%s1632_s9 + $0x18] sm:$0xff] %v867_v1  ;;  %v904_v34 = vadd.f32 %v1052_v27, %v867_v1 }
0x1684   :  { %887 = vst [vmem:[%s1632_s9 + $0x8] sm:$0xff] %v859_v15  ;;  %909 = vmax.xlane.f32.xlu0 %v901_v28  ;;  %v902_v31 = vadd.f32 %v1052_v27, %v859_v15 }
0x1686   :  { %911 = vmax.xlane.f32.xlu1 %v902_v31 }
0x1688   :  { %913 = vmax.xlane.f32.xlu0 %v903_v32 }
0x168c   :  { %915 = vmax.xlane.f32.xlu0 %v904_v34 }
0x16f1   :  { %v1178_v35 = vpop.f32.mrb[20].mxu1 }
0x16f2   :  { %v880_v36 = vadd.f32 %v1178_v35, %v1045_v33  ;;  %v871_v37 = vpop.f32.mrb[21].mxu1 }
0x16f3   :  { %v872_v38 = vadd.f32 %v1045_v33, %v871_v37  ;;  %v1179_v39 = vpop.f32.mrb[22].mxu1 }
0x16f4   :  { %892 = vst [vmem:[%s1632_s9 + $0x30] sm:$0xff] %v880_v36  ;;  %v883_v40 = vadd.f32 %v1179_v39, %v1045_v33  ;;  %v874_v41 = vpop.f32.mrb[23].mxu1  ;;  %v907_v45 = vadd.f32 %v1052_v27, %v880_v36 }
0x16f5   :  { %890 = vst [vmem:[%s1632_s9 + $0x20] sm:$0xff] %v872_v38  ;;  %v875_v42 = vadd.f32 %v1045_v33, %v874_v41  ;;  %v905_v43 = vadd.f32 %v1052_v27, %v872_v38 }
0x16f6   :  { %893 = vst [vmem:[%s1632_s9 + $0x38] sm:$0xff] %v883_v40  ;;  %v908_v46 = vadd.f32 %v1052_v27, %v883_v40 }
0x16f7   :  { %891 = vst [vmem:[%s1632_s9 + $0x28] sm:$0xff] %v875_v42  ;;  %917 = vmax.xlane.f32.xlu1 %v905_v43  ;;  %v906_v44 = vadd.f32 %v1052_v27, %v875_v42  ;;  %s1297_s9 = smov 96  }
0x16f9   :  { %919 = vmax.xlane.f32.xlu0 %v906_v44 }
0x16fb   :  { %921 = vmax.xlane.f32.xlu1 %v907_v45 }
0x16fd   :  { %923 = vmax.xlane.f32.xlu0 %v908_v46 }
0x1711   :  { %v910_v47 = vpop.xlane.xlu0 %909 }
0x1712   :  { %v925_v48 = vsub.f32 %v901_v28, %v910_v47 }
0x1713   :  { %v912_v50 = vpop.xlane.xlu1 %911 }
0x1714   :  { %v933_v18 = vmul.f32 1.442695, %v925_v48  ;;  %v926_v22 = vsub.f32 %v902_v31, %v912_v50 }
0x1715   :  { %v914_v51 = vpop.xlane.xlu0 %913 }
0x1716   :  { %1261 = vpow2.f32 %v933_v18  ;;  %v935_v52 = vmul.f32 1.442695, %v926_v22  ;;  %v927_v54 = vsub.f32 %v903_v32, %v914_v51 }
0x1718   :  { %1263 = vpow2.f32 %v935_v52  ;;  %v937_v55 = vmul.f32 1.442695, %v927_v54 }
0x1719   :  { %v916_v56 = vpop.xlane.xlu0 %915 }
0x171a   :  { %1265 = vpow2.f32 %v937_v55  ;;  %v928_v57 = vsub.f32 %v904_v34, %v916_v56 }
0x171c   :  { %v939_v58 = vmul.f32 1.442695, %v928_v57 }
0x171e   :  { %1267 = vpow2.f32 %v939_v58 }
0x1720   :  { %v1262_v59 = vpop.eup %1261 }
0x1721   :  { %949 = vadd.xlane.f32.xlu1 %v1262_v59 }
0x1722   :  { %v1264_v60 = vpop.eup %1263 }
0x1723   :  { %951 = vadd.xlane.f32.xlu0 %v1264_v60 }
0x1724   :  { %v1266_v61 = vpop.eup %1265 }
0x1725   :  { %953 = vadd.xlane.f32.xlu1 %v1266_v61 }
0x1728   :  { %v1268_v62 = vpop.eup %1267 }
0x1729   :  { %955 = vadd.xlane.f32.xlu0 %v1268_v62 }
0x1784   :  { %v918_v63 = vpop.xlane.xlu1 %917 }
0x1785   :  { %v929_v3 = vsub.f32 %v905_v43, %v918_v63 }
0x1786   :  { %v920_v0 = vpop.xlane.xlu0 %919 }
0x1787   :  { %v930_v26 = vsub.f32 %v906_v44, %v920_v0  ;;  %v941_v10 = vmul.f32 1.442695, %v929_v3 }
0x1788   :  { %v922_v2 = vpop.xlane.xlu1 %921 }
0x1789   :  { %v931_v4 = vsub.f32 %v907_v45, %v922_v2  ;;  %v943_v13 = vmul.f32 1.442695, %v930_v26 }
0x178a   :  { %v924_v6 = vpop.xlane.xlu0 %923 }
0x178b   :  { %v945_v9 = vmul.f32 1.442695, %v931_v4  ;;  %v932_v24 = vsub.f32 %v908_v46, %v924_v6 }
0x178d   :  { %1269 = vpow2.f32 %v945_v9  ;;  %v947_v11 = vmul.f32 1.442695, %v932_v24 }
0x178f   :  { %1271 = vpow2.f32 %v947_v11 }
0x1790   :  { %1273 = vpow2.f32 %v941_v10 }
0x1791   :  { %1275 = vpow2.f32 %v943_v13 }
0x1797   :  { %v1270_v49 = vpop.eup %1269 }
0x1798   :  { %961 = vadd.xlane.f32.xlu1 %v1270_v49 }
0x1799   :  { %v1272_v8 = vpop.eup %1271 }
0x179a   :  { %963 = vadd.xlane.f32.xlu0 %v1272_v8  ;;  %v1274_v12 = vpop.eup %1273 }
0x179b   :  { %v1276_v16 = vpop.eup %1275 }
0x179c   :  { %957 = vadd.xlane.f32.xlu1 %v1274_v12 }
0x179e   :  { %959 = vadd.xlane.f32.xlu0 %v1276_v16 }
0x17ad   :  { %990 = vrot.lane.b32.xlu1 %v1551_v17, %s1296_s23 }
0x17ae   :  { %v950_v19 = vpop.xlane.xlu1 %949 }
0x17af   :  { %1277 = vrcp.f32 %v950_v19 }
0x17b0   :  { %v952_v20 = vpop.xlane.xlu0 %951 }
0x17b1   :  { %1279 = vrcp.f32 %v952_v20 }
0x17b2   :  { %v954_v21 = vpop.xlane.xlu1 %953 }
0x17b3   :  { %1281 = vrcp.f32 %v954_v21 }
0x17b4   :  { %995 = vrot.lane.b32.xlu0 %v1543_v14, %s1297_s9 }
0x17b6   :  { %v956_v23 = vpop.xlane.xlu0 %955 }
0x17b7   :  { %1283 = vrcp.f32 %v956_v23 }
0x17b9   :  { %v1278_v33 = vpop.eup %1277 }
0x17ba   :  { %v973_v53 = vmul.f32 %v1278_v33, %v1262_v59 }
0x17bb   :  { %v1280_v25 = vpop.eup %1279 }
0x17bc   :  { %981 = vst [vmem:[%s1633_s10] sm:$0xff] %v973_v53  ;;  %v974_v5 = vmul.f32 %v1280_v25, %v1264_v60 }
0x17bd   :  { %v1282_v17 = vpop.eup %1281 }
0x17be   :  { %982 = vst [vmem:[%s1633_s10 + $0x8] sm:$0xff] %v974_v5  ;;  %v975_v27 = vmul.f32 %v1282_v17, %v1266_v61 }
0x17c0   :  { %983 = vst [vmem:[%s1633_s10 + $0x10] sm:$0xff] %v975_v27 }
0x17c1   :  { %v1284_v14 = vpop.eup %1283 }
0x17c2   :  { %v976_v29 = vmul.f32 %v1284_v14, %v1268_v62 }
0x17c4   :  { %984 = vst [vmem:[%s1633_s10 + $0x18] sm:$0xff] %v976_v29 }
0x1825   :  { %v962_v30 = vpop.xlane.xlu1 %961 }
0x1826   :  { %1285 = vrcp.f32 %v962_v30 }
0x1827   :  { %v964_v1 = vpop.xlane.xlu0 %963 }
0x1828   :  { %1287 = vrcp.f32 %v964_v1 }
0x1829   :  { %v958_v7 = vpop.xlane.xlu1 %957 }
0x182a   :  { %1289 = vrcp.f32 %v958_v7 }
0x182b   :  { %v960_v15 = vpop.xlane.xlu0 %959 }
0x182c   :  { %1291 = vrcp.f32 %v960_v15 }
0x182d   :  { %v991_v28 = vpop.permute.xlu1 %990 }
0x182e   :  { %993 = vst.msk [vmem:[%s1634_s11] sm:$0xff] %vm193_vm3, %v991_v28 }
0x182f   :  { %v996_v31 = vpop.permute.xlu0 %995 }
0x1830   :  { %v1286_v32 = vpop.eup %1285  ;;  %998 = vst.msk [vmem:[%s1635_s12] sm:$0xff] %vm193_vm3, %v996_v31 }
0x1831   :  { %v979_v34 = vmul.f32 %v1286_v32, %v1270_v49 }
0x1832   :  { %v1288_v35 = vpop.eup %1287 }
0x1833   :  { %987 = vst [vmem:[%s1633_s10 + $0x30] sm:$0xff] %v979_v34  ;;  %v980_v36 = vmul.f32 %v1288_v35, %v1272_v8 }
0x1834   :  { %v1290_v37 = vpop.eup %1289 }
0x1835   :  { %988 = vst [vmem:[%s1633_s10 + $0x38] sm:$0xff] %v980_v36  ;;  %v977_v38 = vmul.f32 %v1290_v37, %v1274_v12 }
0x1836   :  { %v1292_v39 = vpop.eup %1291 }
0x1837   :  { %985 = vst [vmem:[%s1633_s10 + $0x20] sm:$0xff] %v977_v38  ;;  %v978_v40 = vmul.f32 %v1292_v39, %v1276_v16 }
0x1839   :  { %986 = vst [vmem:[%s1633_s10 + $0x28] sm:$0xff] %v978_v40 }

</bundles_post_ra>
